<compile_context>
chip_gen: v7x
topology: tpu7x:2x2x1
jax: 0.10.0
libtpu: 0.0.40
codegen_flags: <defaults>
</compile_context>

<pallas_src>
import jax
import jax.numpy as jnp
from jax import lax
from jax.experimental import pallas as pl
from jax.experimental.pallas import tpu as pltpu


def _mm(a, b):
    # bf16 operands on the MXU, f32 accumulation (single native MXU pass).
    return jnp.dot(a.astype(jnp.bfloat16), b.astype(jnp.bfloat16),
                   preferred_element_type=jnp.float32)


# ---------------------------------------------------------------------------
# Fused kernel:
#   phase 1 (unrolled over t): 2-layer GCN  A @ (X @ W) + b, ReLU between, then
#                              F.normalize(x, p=2, dim=1)
#   phase 2a: hoisted x @ W_ih_cat for ALL timesteps at once
#   phase 2b (serial, unrolled): GRU recurrence (one h_prev @ W_hh_cat per step)
#                                fused with LayerNorm(eps=1e-5)
# Gate order in the concatenated weights/biases is (r, z, n), matching torch GRU.
# ---------------------------------------------------------------------------
def gcrn_kernel(x_ref, a_ref, w1_ref, b1_ref, w2_ref, b2_ref,
                wih_ref, whh_ref, bih_ref, bhh_ref, g_ref, bt_ref,
                o_ref):
    T, N, _ = x_ref.shape
    D = o_ref.shape[-1]

    wih = wih_ref[...]      # (D, 3D)   [r | z | n]
    whh = whh_ref[...]      # (D, 3D)
    bih = bih_ref[...]      # (1, 3D)
    bhh = bhh_ref[...]      # (1, 3D)
    gamma = g_ref[...]      # (1, D)
    beta = bt_ref[...]      # (1, D)

    # ---- phase 1: per-timestep GCN + row L2 normalize (parallel, unrolled) ----
    hx_rows = []
    for t in range(T):
        a = a_ref[t]                                              # (N, N)
        h = _mm(a, _mm(x_ref[t], w1_ref[t])) + b1_ref[t]          # (N, H)
        h = jnp.maximum(h, 0.0)                                   # ReLU (dropout=0)
        h = _mm(a, _mm(h, w2_ref[t])) + b2_ref[t]                 # (N, D)
        # F.normalize(h, p=2, dim=1) with eps=1e-12 == h * rsqrt(max(||h||^2, 1e-24))
        inv = lax.rsqrt(jnp.maximum(jnp.sum(h * h, axis=-1, keepdims=True), 1e-24))
        hx_rows.append(h * inv)
    hx = jnp.concatenate(hx_rows, axis=0)                         # (T*N, D)

    # ---- phase 2a: input-gate projection hoisted out of the serial loop ----
    gx_all = _mm(hx, wih) + bih                                   # (T*N, 3D)

    # ---- phase 2b: GRU recurrence + LayerNorm (serial over t, unrolled) ----
    h = jnp.zeros((N, D), jnp.float32)
    for t in range(T):
        gx = gx_all[t * N:(t + 1) * N, :]                         # (N, 3D) static slice
        gh = _mm(h, whh) + bhh                                    # (N, 3D) one wide matmul
        r = jax.nn.sigmoid(gx[:, 0:D] + gh[:, 0:D])
        z = jax.nn.sigmoid(gx[:, D:2 * D] + gh[:, D:2 * D])
        n = jnp.tanh(gx[:, 2 * D:] + r * gh[:, 2 * D:])
        h = (1.0 - z) * n + z * h
        # LayerNorm over last dim, eps=1e-5, elementwise affine
        mu = jnp.mean(h, axis=-1, keepdims=True)
        var = jnp.mean((h - mu) ** 2, axis=-1, keepdims=True)
        o_ref[t] = (h - mu) * lax.rsqrt(var + 1e-5) * gamma + beta


def _full_spec(shape):
    n = len(shape)
    return pl.BlockSpec(shape, lambda i, _n=n: (0,) * _n)


@jax.jit
def gcrn_forward(x_seq, a_seq, p):
    T, N, F_in = x_seq.shape
    H = p["w1"].shape[-1]
    D = p["w2"].shape[-1]

    # Concatenate the (r, z, n) gate weights/biases along the output (lane) dim so the
    # kernel performs one wide matmul per path instead of three tiny ones.
    wih = jnp.concatenate([p["w_ih"][0], p["w_ih"][1], p["w_ih"][2]], axis=1)  # (D, 3D)
    whh = jnp.concatenate([p["w_hh"][0], p["w_hh"][1], p["w_hh"][2]], axis=1)  # (D, 3D)
    bih = jnp.concatenate([p["b_ih"][0], p["b_ih"][1], p["b_ih"][2]], axis=1)  # (1, 3D)
    bhh = jnp.concatenate([p["b_hh"][0], p["b_hh"][1], p["b_hh"][2]], axis=1)  # (1, 3D)

    return pl.pallas_call(
        gcrn_kernel,
        out_shape=jax.ShapeDtypeStruct((T, N, D), jnp.float32),
        grid_spec=pltpu.PrefetchScalarGridSpec(
            num_scalar_prefetch=0,
            grid=(1,),
            in_specs=[
                _full_spec((T, N, F_in)),      # x_seq
                _full_spec((T, N, N)),         # a_seq
                _full_spec((T, F_in, H)),      # w1
                _full_spec((T, 1, H)),         # b1
                _full_spec((T, H, D)),         # w2
                _full_spec((T, 1, D)),         # b2
                _full_spec((D, 3 * D)),        # W_ih (r|z|n)
                _full_spec((D, 3 * D)),        # W_hh (r|z|n)
                _full_spec((1, 3 * D)),        # b_ih
                _full_spec((1, 3 * D)),        # b_hh
                _full_spec((1, D)),            # LayerNorm gamma
                _full_spec((1, D)),            # LayerNorm beta
            ],
            out_specs=_full_spec((T, N, D)),
        ),
        compiler_params=pltpu.CompilerParams(
            dimension_semantics=("arbitrary",)),
    )(x_seq, a_seq, p["w1"], p["b1"], p["w2"], p["b2"],
      wih, whh, bih, bhh, p["ln_g"], p["ln_b"])


# ---------------------------------------------------------------------------
# Pure-JAX reference (same math, same bf16-MXU matmul precision) for self-check
# ---------------------------------------------------------------------------
def gcrn_reference(x_seq, a_seq, p):
    T, N, _ = x_seq.shape
    D = p["w2"].shape[-1]
    hx = []
    for t in range(T):
        h = _mm(a_seq[t], _mm(x_seq[t], p["w1"][t])) + p["b1"][t]
        h = jnp.maximum(h, 0.0)
        h = _mm(a_seq[t], _mm(h, p["w2"][t])) + p["b2"][t]
        nrm = jnp.sqrt(jnp.sum(h * h, -1, keepdims=True))
        hx.append(h / jnp.maximum(nrm, 1e-12))
    hprev = jnp.zeros((N, D), jnp.float32)
    outs = []
    for t in range(T):
        x = hx[t]
        r = jax.nn.sigmoid(_mm(x, p["w_ih"][0]) + p["b_ih"][0]
                           + _mm(hprev, p["w_hh"][0]) + p["b_hh"][0])
        z = jax.nn.sigmoid(_mm(x, p["w_ih"][1]) + p["b_ih"][1]
                           + _mm(hprev, p["w_hh"][1]) + p["b_hh"][1])
        n = jnp.tanh(_mm(x, p["w_ih"][2]) + p["b_ih"][2]
                     + r * (_mm(hprev, p["w_hh"][2]) + p["b_hh"][2]))
        h = (1.0 - z) * n + z * hprev
        hprev = h
        mu = jnp.mean(h, -1, keepdims=True)
        var = jnp.mean((h - mu) ** 2, -1, keepdims=True)
        outs.append((h - mu) * lax.rsqrt(var + 1e-5) * p["ln_g"] + p["ln_b"])
    return jnp.stack(outs, axis=0)


def build_norm_adj(src, dst, n):
    # dense symmetric adjacency + self loops, D^{-1/2} A D^{-1/2}  (GCNConv norm)
    a = jnp.zeros((n, n), jnp.float32)
    a = a.at[src, dst].set(1.0)
    a = a.at[dst, src].set(1.0)
    a = jnp.minimum(a + jnp.eye(n, dtype=jnp.float32), 1.0)
    deg = a.sum(-1)
    dinv = lax.rsqrt(jnp.maximum(deg, 1e-12))
    return a * dinv[:, None] * dinv[None, :]


if __name__ == "__main__":
    T, N, F_IN, H, D = 4, 16, 8, 32, 16   # duration, nodes, input, hidden, output
    key = jax.random.PRNGKey(0)
    keys = jax.random.split(key, 12)

    # inputs: x_list (T, N, F_in) and per-time edge lists -> dense normalized adjacency
    x_seq = jax.random.normal(keys[0], (T, N, F_IN), jnp.float32)
    E = 40
    src = jax.random.randint(keys[1], (T, E), 0, N)
    dst = jax.random.randint(keys[2], (T, E), 0, N)
    a_seq = jnp.stack([build_norm_adj(src[t], dst[t], N) for t in range(T)], 0)

    # deterministic parameter init (shapes match GCRN.__init__ with duration=T)
    ku = 1.0 / jnp.sqrt(jnp.float32(D))
    params = {
        "w1": jax.random.normal(keys[3], (T, F_IN, H), jnp.float32) / jnp.sqrt(jnp.float32(F_IN)),
        "b1": 0.01 * jax.random.normal(keys[4], (T, 1, H), jnp.float32),
        "w2": jax.random.normal(keys[5], (T, H, D), jnp.float32) / jnp.sqrt(jnp.float32(H)),
        "b2": 0.01 * jax.random.normal(keys[6], (T, 1, D), jnp.float32),
        "w_ih": jax.random.uniform(keys[7], (3, D, D), jnp.float32, -ku, ku),
        "w_hh": jax.random.uniform(keys[8], (3, D, D), jnp.float32, -ku, ku),
        "b_ih": jax.random.uniform(keys[9], (3, 1, D), jnp.float32, -ku, ku),
        "b_hh": jax.random.uniform(keys[10], (3, 1, D), jnp.float32, -ku, ku),
        "ln_g": jnp.ones((1, D), jnp.float32),
        "ln_b": jnp.zeros((1, D), jnp.float32),
    }

    out = jax.block_until_ready(gcrn_forward(x_seq, a_seq, params))
    ref = jax.block_until_ready(gcrn_reference(x_seq, a_seq, params))

    assert out.shape == (T, N, D)
    err = float(jnp.max(jnp.abs(out - ref)))
    if not jnp.allclose(out, ref, rtol=2e-3, atol=2e-3):
        raise AssertionError(f"mismatch vs reference, max abs err = {err}")
    print("KERNEL_OK")
</pallas_src>

<mosaic_0001>
module attributes {stable_mosaic.version = 11 : i64} {
  func.func @gcrn_kernel(%arg0: i32, %arg1: memref<4x16x8xf32, #tpu.memory_space<vmem>>, %arg2: memref<4x16x16xf32, #tpu.memory_space<vmem>>, %arg3: memref<4x8x32xf32, #tpu.memory_space<vmem>>, %arg4: memref<4x1x32xf32, #tpu.memory_space<vmem>>, %arg5: memref<4x32x16xf32, #tpu.memory_space<vmem>>, %arg6: memref<4x1x16xf32, #tpu.memory_space<vmem>>, %arg7: memref<16x48xf32, #tpu.memory_space<vmem>>, %arg8: memref<16x48xf32, #tpu.memory_space<vmem>>, %arg9: memref<1x48xf32, #tpu.memory_space<vmem>>, %arg10: memref<1x48xf32, #tpu.memory_space<vmem>>, %arg11: memref<1x16xf32, #tpu.memory_space<vmem>>, %arg12: memref<1x16xf32, #tpu.memory_space<vmem>>, %arg13: memref<4x16x16xf32, #tpu.memory_space<vmem>>) attributes {dimension_semantics = [#tpu.dimension_semantics<arbitrary>], iteration_bounds = array<i64: 1>, scalar_prefetch = 0 : i64, scratch_operands = 0 : i64, tpu.core_type = #tpu.core_type<tc>, window_params = [{pipeline_mode = #tpu.pipeline_mode<synchronous>, transform_indices = @transform_0, window_bounds = array<i64: 4, 16, 8>}, {pipeline_mode = #tpu.pipeline_mode<synchronous>, transform_indices = @transform_1, window_bounds = array<i64: 4, 16, 16>}, {pipeline_mode = #tpu.pipeline_mode<synchronous>, transform_indices = @transform_2, window_bounds = array<i64: 4, 8, 32>}, {pipeline_mode = #tpu.pipeline_mode<synchronous>, transform_indices = @transform_3, window_bounds = array<i64: 4, 1, 32>}, {pipeline_mode = #tpu.pipeline_mode<synchronous>, transform_indices = @transform_4, window_bounds = array<i64: 4, 32, 16>}, {pipeline_mode = #tpu.pipeline_mode<synchronous>, transform_indices = @transform_5, window_bounds = array<i64: 4, 1, 16>}, {pipeline_mode = #tpu.pipeline_mode<synchronous>, transform_indices = @transform_6, window_bounds = array<i64: 16, 48>}, {pipeline_mode = #tpu.pipeline_mode<synchronous>, transform_indices = @transform_7, window_bounds = array<i64: 16, 48>}, {pipeline_mode = #tpu.pipeline_mode<synchronous>, transform_indices = @transform_8, window_bounds = array<i64: 1, 48>}, {pipeline_mode = #tpu.pipeline_mode<synchronous>, transform_indices = @transform_9, window_bounds = array<i64: 1, 48>}, {pipeline_mode = #tpu.pipeline_mode<synchronous>, transform_indices = @transform_10, window_bounds = array<i64: 1, 16>}, {pipeline_mode = #tpu.pipeline_mode<synchronous>, transform_indices = @transform_11, window_bounds = array<i64: 1, 16>}, {pipeline_mode = #tpu.pipeline_mode<synchronous>, transform_indices = @transform_12, window_bounds = array<i64: 4, 16, 16>}]} {
    %c0 = arith.constant 0 : index
    %c0_0 = arith.constant 0 : index
    %0 = vector.load %arg7[%c0, %c0_0] : memref<16x48xf32, #tpu.memory_space<vmem>>, vector<16x48xf32>
    %c0_1 = arith.constant 0 : index
    %c0_2 = arith.constant 0 : index
    %1 = vector.load %arg8[%c0_1, %c0_2] : memref<16x48xf32, #tpu.memory_space<vmem>>, vector<16x48xf32>
    %c0_3 = arith.constant 0 : index
    %c0_4 = arith.constant 0 : index
    %2 = vector.load %arg9[%c0_3, %c0_4] : memref<1x48xf32, #tpu.memory_space<vmem>>, vector<1x48xf32>
    %c0_5 = arith.constant 0 : index
    %c0_6 = arith.constant 0 : index
    %3 = vector.load %arg10[%c0_5, %c0_6] : memref<1x48xf32, #tpu.memory_space<vmem>>, vector<1x48xf32>
    %c0_7 = arith.constant 0 : index
    %c0_8 = arith.constant 0 : index
    %4 = vector.load %arg11[%c0_7, %c0_8] : memref<1x16xf32, #tpu.memory_space<vmem>>, vector<1x16xf32>
    %c0_9 = arith.constant 0 : index
    %c0_10 = arith.constant 0 : index
    %5 = vector.load %arg12[%c0_9, %c0_10] : memref<1x16xf32, #tpu.memory_space<vmem>>, vector<1x16xf32>
    %c0_11 = arith.constant 0 : index
    %c0_12 = arith.constant 0 : index
    %c0_13 = arith.constant 0 : index
    %6 = vector.load %arg2[%c0_11, %c0_12, %c0_13] : memref<4x16x16xf32, #tpu.memory_space<vmem>>, vector<1x16x16xf32>
    %7 = vector.shape_cast %6 : vector<1x16x16xf32> to vector<16x16xf32>
    %c0_14 = arith.constant 0 : index
    %c0_15 = arith.constant 0 : index
    %c0_16 = arith.constant 0 : index
    %8 = vector.load %arg1[%c0_14, %c0_15, %c0_16] : memref<4x16x8xf32, #tpu.memory_space<vmem>>, vector<1x16x8xf32>
    %9 = vector.shape_cast %8 : vector<1x16x8xf32> to vector<16x8xf32>
    %c0_17 = arith.constant 0 : index
    %c0_18 = arith.constant 0 : index
    %c0_19 = arith.constant 0 : index
    %10 = vector.load %arg3[%c0_17, %c0_18, %c0_19] : memref<4x8x32xf32, #tpu.memory_space<vmem>>, vector<1x8x32xf32>
    %11 = vector.shape_cast %10 : vector<1x8x32xf32> to vector<8x32xf32>
    %12 = arith.truncf %9 : vector<16x8xf32> to vector<16x8xbf16>
    %13 = arith.truncf %11 : vector<8x32xf32> to vector<8x32xbf16>
    %cst = arith.constant dense<0.000000e+00> : vector<16x32xf32>
    %14 = tpu.matmul %12, %13, %cst {dimension_numbers = #tpu.dot_dimension_numbers<[1], [0], [0], [1], [0, 0, 1, 1], [], []>} : vector<16x8xbf16>, vector<8x32xbf16>, vector<16x32xf32> -> vector<16x32xf32>
    %15 = arith.truncf %7 : vector<16x16xf32> to vector<16x16xbf16>
    %16 = arith.truncf %14 : vector<16x32xf32> to vector<16x32xbf16>
    %cst_20 = arith.constant dense<0.000000e+00> : vector<16x32xf32>
    %17 = tpu.matmul %15, %16, %cst_20 {dimension_numbers = #tpu.dot_dimension_numbers<[1], [0], [0], [1], [0, 0, 1, 1], [], []>} : vector<16x16xbf16>, vector<16x32xbf16>, vector<16x32xf32> -> vector<16x32xf32>
    %c0_21 = arith.constant 0 : index
    %c0_22 = arith.constant 0 : index
    %c0_23 = arith.constant 0 : index
    %18 = vector.load %arg4[%c0_21, %c0_22, %c0_23] : memref<4x1x32xf32, #tpu.memory_space<vmem>>, vector<1x1x32xf32>
    %19 = vector.shape_cast %18 : vector<1x1x32xf32> to vector<1x32xf32>
    %20 = vector.broadcast %19 : vector<1x32xf32> to vector<16x32xf32>
    %21 = arith.addf %17, %20 : vector<16x32xf32>
    %cst_24 = arith.constant 0.000000e+00 : f32
    %22 = vector.broadcast %cst_24 : f32 to vector<16x32xf32>
    %23 = arith.maximumf %21, %22 : vector<16x32xf32>
    %c0_25 = arith.constant 0 : index
    %c0_26 = arith.constant 0 : index
    %c0_27 = arith.constant 0 : index
    %24 = vector.load %arg5[%c0_25, %c0_26, %c0_27] : memref<4x32x16xf32, #tpu.memory_space<vmem>>, vector<1x32x16xf32>
    %25 = vector.shape_cast %24 : vector<1x32x16xf32> to vector<32x16xf32>
    %26 = arith.truncf %23 : vector<16x32xf32> to vector<16x32xbf16>
    %27 = arith.truncf %25 : vector<32x16xf32> to vector<32x16xbf16>
    %cst_28 = arith.constant dense<0.000000e+00> : vector<16x16xf32>
    %28 = tpu.matmul %26, %27, %cst_28 {dimension_numbers = #tpu.dot_dimension_numbers<[1], [0], [0], [1], [0, 0, 1, 1], [], []>} : vector<16x32xbf16>, vector<32x16xbf16>, vector<16x16xf32> -> vector<16x16xf32>
    %29 = arith.truncf %7 : vector<16x16xf32> to vector<16x16xbf16>
    %30 = arith.truncf %28 : vector<16x16xf32> to vector<16x16xbf16>
    %cst_29 = arith.constant dense<0.000000e+00> : vector<16x16xf32>
    %31 = tpu.matmul %29, %30, %cst_29 {dimension_numbers = #tpu.dot_dimension_numbers<[1], [0], [0], [1], [0, 0, 1, 1], [], []>} : vector<16x16xbf16>, vector<16x16xbf16>, vector<16x16xf32> -> vector<16x16xf32>
    %c0_30 = arith.constant 0 : index
    %c0_31 = arith.constant 0 : index
    %c0_32 = arith.constant 0 : index
    %32 = vector.load %arg6[%c0_30, %c0_31, %c0_32] : memref<4x1x16xf32, #tpu.memory_space<vmem>>, vector<1x1x16xf32>
    %33 = vector.shape_cast %32 : vector<1x1x16xf32> to vector<1x16xf32>
    %34 = vector.broadcast %33 : vector<1x16xf32> to vector<16x16xf32>
    %35 = arith.addf %31, %34 : vector<16x16xf32>
    %36 = arith.mulf %35, %35 : vector<16x16xf32>
    %cst_33 = arith.constant dense<0.000000e+00> : vector<16xf32>
    %37 = vector.multi_reduction <add>, %36, %cst_33 [1] : vector<16x16xf32> to vector<16xf32>
    %38 = vector.shape_cast %37 : vector<16xf32> to vector<16x1xf32>
    %cst_34 = arith.constant 1.000000e-24 : f32
    %39 = vector.broadcast %cst_34 : f32 to vector<16x1xf32>
    %40 = arith.maximumf %38, %39 : vector<16x1xf32>
    %41 = math.rsqrt %40 : vector<16x1xf32>
    %42 = vector.broadcast %41 : vector<16x1xf32> to vector<16x16xf32>
    %43 = arith.mulf %35, %42 : vector<16x16xf32>
    %c1 = arith.constant 1 : index
    %c0_35 = arith.constant 0 : index
    %c0_36 = arith.constant 0 : index
    %44 = vector.load %arg2[%c1, %c0_35, %c0_36] : memref<4x16x16xf32, #tpu.memory_space<vmem>>, vector<1x16x16xf32>
    %45 = vector.shape_cast %44 : vector<1x16x16xf32> to vector<16x16xf32>
    %c1_37 = arith.constant 1 : index
    %c0_38 = arith.constant 0 : index
    %c0_39 = arith.constant 0 : index
    %46 = vector.load %arg1[%c1_37, %c0_38, %c0_39] : memref<4x16x8xf32, #tpu.memory_space<vmem>>, vector<1x16x8xf32>
    %47 = vector.shape_cast %46 : vector<1x16x8xf32> to vector<16x8xf32>
    %c1_40 = arith.constant 1 : index
    %c0_41 = arith.constant 0 : index
    %c0_42 = arith.constant 0 : index
    %48 = vector.load %arg3[%c1_40, %c0_41, %c0_42] : memref<4x8x32xf32, #tpu.memory_space<vmem>>, vector<1x8x32xf32>
    %49 = vector.shape_cast %48 : vector<1x8x32xf32> to vector<8x32xf32>
    %50 = arith.truncf %47 : vector<16x8xf32> to vector<16x8xbf16>
    %51 = arith.truncf %49 : vector<8x32xf32> to vector<8x32xbf16>
    %cst_43 = arith.constant dense<0.000000e+00> : vector<16x32xf32>
    %52 = tpu.matmul %50, %51, %cst_43 {dimension_numbers = #tpu.dot_dimension_numbers<[1], [0], [0], [1], [0, 0, 1, 1], [], []>} : vector<16x8xbf16>, vector<8x32xbf16>, vector<16x32xf32> -> vector<16x32xf32>
    %53 = arith.truncf %45 : vector<16x16xf32> to vector<16x16xbf16>
    %54 = arith.truncf %52 : vector<16x32xf32> to vector<16x32xbf16>
    %cst_44 = arith.constant dense<0.000000e+00> : vector<16x32xf32>
    %55 = tpu.matmul %53, %54, %cst_44 {dimension_numbers = #tpu.dot_dimension_numbers<[1], [0], [0], [1], [0, 0, 1, 1], [], []>} : vector<16x16xbf16>, vector<16x32xbf16>, vector<16x32xf32> -> vector<16x32xf32>
    %c1_45 = arith.constant 1 : index
    %c0_46 = arith.constant 0 : index
    %c0_47 = arith.constant 0 : index
    %56 = vector.load %arg4[%c1_45, %c0_46, %c0_47] : memref<4x1x32xf32, #tpu.memory_space<vmem>>, vector<1x1x32xf32>
    %57 = vector.shape_cast %56 : vector<1x1x32xf32> to vector<1x32xf32>
    %58 = vector.broadcast %57 : vector<1x32xf32> to vector<16x32xf32>
    %59 = arith.addf %55, %58 : vector<16x32xf32>
    %cst_48 = arith.constant 0.000000e+00 : f32
    %60 = vector.broadcast %cst_48 : f32 to vector<16x32xf32>
    %61 = arith.maximumf %59, %60 : vector<16x32xf32>
    %c1_49 = arith.constant 1 : index
    %c0_50 = arith.constant 0 : index
    %c0_51 = arith.constant 0 : index
    %62 = vector.load %arg5[%c1_49, %c0_50, %c0_51] : memref<4x32x16xf32, #tpu.memory_space<vmem>>, vector<1x32x16xf32>
    %63 = vector.shape_cast %62 : vector<1x32x16xf32> to vector<32x16xf32>
    %64 = arith.truncf %61 : vector<16x32xf32> to vector<16x32xbf16>
    %65 = arith.truncf %63 : vector<32x16xf32> to vector<32x16xbf16>
    %cst_52 = arith.constant dense<0.000000e+00> : vector<16x16xf32>
    %66 = tpu.matmul %64, %65, %cst_52 {dimension_numbers = #tpu.dot_dimension_numbers<[1], [0], [0], [1], [0, 0, 1, 1], [], []>} : vector<16x32xbf16>, vector<32x16xbf16>, vector<16x16xf32> -> vector<16x16xf32>
    %67 = arith.truncf %45 : vector<16x16xf32> to vector<16x16xbf16>
    %68 = arith.truncf %66 : vector<16x16xf32> to vector<16x16xbf16>
    %cst_53 = arith.constant dense<0.000000e+00> : vector<16x16xf32>
    %69 = tpu.matmul %67, %68, %cst_53 {dimension_numbers = #tpu.dot_dimension_numbers<[1], [0], [0], [1], [0, 0, 1, 1], [], []>} : vector<16x16xbf16>, vector<16x16xbf16>, vector<16x16xf32> -> vector<16x16xf32>
    %c1_54 = arith.constant 1 : index
    %c0_55 = arith.constant 0 : index
    %c0_56 = arith.constant 0 : index
    %70 = vector.load %arg6[%c1_54, %c0_55, %c0_56] : memref<4x1x16xf32, #tpu.memory_space<vmem>>, vector<1x1x16xf32>
    %71 = vector.shape_cast %70 : vector<1x1x16xf32> to vector<1x16xf32>
    %72 = vector.broadcast %71 : vector<1x16xf32> to vector<16x16xf32>
    %73 = arith.addf %69, %72 : vector<16x16xf32>
    %74 = arith.mulf %73, %73 : vector<16x16xf32>
    %cst_57 = arith.constant dense<0.000000e+00> : vector<16xf32>
    %75 = vector.multi_reduction <add>, %74, %cst_57 [1] : vector<16x16xf32> to vector<16xf32>
    %76 = vector.shape_cast %75 : vector<16xf32> to vector<16x1xf32>
    %cst_58 = arith.constant 1.000000e-24 : f32
    %77 = vector.broadcast %cst_58 : f32 to vector<16x1xf32>
    %78 = arith.maximumf %76, %77 : vector<16x1xf32>
    %79 = math.rsqrt %78 : vector<16x1xf32>
    %80 = vector.broadcast %79 : vector<16x1xf32> to vector<16x16xf32>
    %81 = arith.mulf %73, %80 : vector<16x16xf32>
    %c2 = arith.constant 2 : index
    %c0_59 = arith.constant 0 : index
    %c0_60 = arith.constant 0 : index
    %82 = vector.load %arg2[%c2, %c0_59, %c0_60] : memref<4x16x16xf32, #tpu.memory_space<vmem>>, vector<1x16x16xf32>
    %83 = vector.shape_cast %82 : vector<1x16x16xf32> to vector<16x16xf32>
    %c2_61 = arith.constant 2 : index
    %c0_62 = arith.constant 0 : index
    %c0_63 = arith.constant 0 : index
    %84 = vector.load %arg1[%c2_61, %c0_62, %c0_63] : memref<4x16x8xf32, #tpu.memory_space<vmem>>, vector<1x16x8xf32>
    %85 = vector.shape_cast %84 : vector<1x16x8xf32> to vector<16x8xf32>
    %c2_64 = arith.constant 2 : index
    %c0_65 = arith.constant 0 : index
    %c0_66 = arith.constant 0 : index
    %86 = vector.load %arg3[%c2_64, %c0_65, %c0_66] : memref<4x8x32xf32, #tpu.memory_space<vmem>>, vector<1x8x32xf32>
    %87 = vector.shape_cast %86 : vector<1x8x32xf32> to vector<8x32xf32>
    %88 = arith.truncf %85 : vector<16x8xf32> to vector<16x8xbf16>
    %89 = arith.truncf %87 : vector<8x32xf32> to vector<8x32xbf16>
    %cst_67 = arith.constant dense<0.000000e+00> : vector<16x32xf32>
    %90 = tpu.matmul %88, %89, %cst_67 {dimension_numbers = #tpu.dot_dimension_numbers<[1], [0], [0], [1], [0, 0, 1, 1], [], []>} : vector<16x8xbf16>, vector<8x32xbf16>, vector<16x32xf32> -> vector<16x32xf32>
    %91 = arith.truncf %83 : vector<16x16xf32> to vector<16x16xbf16>
    %92 = arith.truncf %90 : vector<16x32xf32> to vector<16x32xbf16>
    %cst_68 = arith.constant dense<0.000000e+00> : vector<16x32xf32>
    %93 = tpu.matmul %91, %92, %cst_68 {dimension_numbers = #tpu.dot_dimension_numbers<[1], [0], [0], [1], [0, 0, 1, 1], [], []>} : vector<16x16xbf16>, vector<16x32xbf16>, vector<16x32xf32> -> vector<16x32xf32>
    %c2_69 = arith.constant 2 : index
    %c0_70 = arith.constant 0 : index
    %c0_71 = arith.constant 0 : index
    %94 = vector.load %arg4[%c2_69, %c0_70, %c0_71] : memref<4x1x32xf32, #tpu.memory_space<vmem>>, vector<1x1x32xf32>
    %95 = vector.shape_cast %94 : vector<1x1x32xf32> to vector<1x32xf32>
    %96 = vector.broadcast %95 : vector<1x32xf32> to vector<16x32xf32>
    %97 = arith.addf %93, %96 : vector<16x32xf32>
    %cst_72 = arith.constant 0.000000e+00 : f32
    %98 = vector.broadcast %cst_72 : f32 to vector<16x32xf32>
    %99 = arith.maximumf %97, %98 : vector<16x32xf32>
    %c2_73 = arith.constant 2 : index
    %c0_74 = arith.constant 0 : index
    %c0_75 = arith.constant 0 : index
    %100 = vector.load %arg5[%c2_73, %c0_74, %c0_75] : memref<4x32x16xf32, #tpu.memory_space<vmem>>, vector<1x32x16xf32>
    %101 = vector.shape_cast %100 : vector<1x32x16xf32> to vector<32x16xf32>
    %102 = arith.truncf %99 : vector<16x32xf32> to vector<16x32xbf16>
    %103 = arith.truncf %101 : vector<32x16xf32> to vector<32x16xbf16>
    %cst_76 = arith.constant dense<0.000000e+00> : vector<16x16xf32>
    %104 = tpu.matmul %102, %103, %cst_76 {dimension_numbers = #tpu.dot_dimension_numbers<[1], [0], [0], [1], [0, 0, 1, 1], [], []>} : vector<16x32xbf16>, vector<32x16xbf16>, vector<16x16xf32> -> vector<16x16xf32>
    %105 = arith.truncf %83 : vector<16x16xf32> to vector<16x16xbf16>
    %106 = arith.truncf %104 : vector<16x16xf32> to vector<16x16xbf16>
    %cst_77 = arith.constant dense<0.000000e+00> : vector<16x16xf32>
    %107 = tpu.matmul %105, %106, %cst_77 {dimension_numbers = #tpu.dot_dimension_numbers<[1], [0], [0], [1], [0, 0, 1, 1], [], []>} : vector<16x16xbf16>, vector<16x16xbf16>, vector<16x16xf32> -> vector<16x16xf32>
    %c2_78 = arith.constant 2 : index
    %c0_79 = arith.constant 0 : index
    %c0_80 = arith.constant 0 : index
    %108 = vector.load %arg6[%c2_78, %c0_79, %c0_80] : memref<4x1x16xf32, #tpu.memory_space<vmem>>, vector<1x1x16xf32>
    %109 = vector.shape_cast %108 : vector<1x1x16xf32> to vector<1x16xf32>
    %110 = vector.broadcast %109 : vector<1x16xf32> to vector<16x16xf32>
    %111 = arith.addf %107, %110 : vector<16x16xf32>
    %112 = arith.mulf %111, %111 : vector<16x16xf32>
    %cst_81 = arith.constant dense<0.000000e+00> : vector<16xf32>
    %113 = vector.multi_reduction <add>, %112, %cst_81 [1] : vector<16x16xf32> to vector<16xf32>
    %114 = vector.shape_cast %113 : vector<16xf32> to vector<16x1xf32>
    %cst_82 = arith.constant 1.000000e-24 : f32
    %115 = vector.broadcast %cst_82 : f32 to vector<16x1xf32>
    %116 = arith.maximumf %114, %115 : vector<16x1xf32>
    %117 = math.rsqrt %116 : vector<16x1xf32>
    %118 = vector.broadcast %117 : vector<16x1xf32> to vector<16x16xf32>
    %119 = arith.mulf %111, %118 : vector<16x16xf32>
    %c3 = arith.constant 3 : index
    %c0_83 = arith.constant 0 : index
    %c0_84 = arith.constant 0 : index
    %120 = vector.load %arg2[%c3, %c0_83, %c0_84] : memref<4x16x16xf32, #tpu.memory_space<vmem>>, vector<1x16x16xf32>
    %121 = vector.shape_cast %120 : vector<1x16x16xf32> to vector<16x16xf32>
    %c3_85 = arith.constant 3 : index
    %c0_86 = arith.constant 0 : index
    %c0_87 = arith.constant 0 : index
    %122 = vector.load %arg1[%c3_85, %c0_86, %c0_87] : memref<4x16x8xf32, #tpu.memory_space<vmem>>, vector<1x16x8xf32>
    %123 = vector.shape_cast %122 : vector<1x16x8xf32> to vector<16x8xf32>
    %c3_88 = arith.constant 3 : index
    %c0_89 = arith.constant 0 : index
    %c0_90 = arith.constant 0 : index
    %124 = vector.load %arg3[%c3_88, %c0_89, %c0_90] : memref<4x8x32xf32, #tpu.memory_space<vmem>>, vector<1x8x32xf32>
    %125 = vector.shape_cast %124 : vector<1x8x32xf32> to vector<8x32xf32>
    %126 = arith.truncf %123 : vector<16x8xf32> to vector<16x8xbf16>
    %127 = arith.truncf %125 : vector<8x32xf32> to vector<8x32xbf16>
    %cst_91 = arith.constant dense<0.000000e+00> : vector<16x32xf32>
    %128 = tpu.matmul %126, %127, %cst_91 {dimension_numbers = #tpu.dot_dimension_numbers<[1], [0], [0], [1], [0, 0, 1, 1], [], []>} : vector<16x8xbf16>, vector<8x32xbf16>, vector<16x32xf32> -> vector<16x32xf32>
    %129 = arith.truncf %121 : vector<16x16xf32> to vector<16x16xbf16>
    %130 = arith.truncf %128 : vector<16x32xf32> to vector<16x32xbf16>
    %cst_92 = arith.constant dense<0.000000e+00> : vector<16x32xf32>
    %131 = tpu.matmul %129, %130, %cst_92 {dimension_numbers = #tpu.dot_dimension_numbers<[1], [0], [0], [1], [0, 0, 1, 1], [], []>} : vector<16x16xbf16>, vector<16x32xbf16>, vector<16x32xf32> -> vector<16x32xf32>
    %c3_93 = arith.constant 3 : index
    %c0_94 = arith.constant 0 : index
    %c0_95 = arith.constant 0 : index
    %132 = vector.load %arg4[%c3_93, %c0_94, %c0_95] : memref<4x1x32xf32, #tpu.memory_space<vmem>>, vector<1x1x32xf32>
    %133 = vector.shape_cast %132 : vector<1x1x32xf32> to vector<1x32xf32>
    %134 = vector.broadcast %133 : vector<1x32xf32> to vector<16x32xf32>
    %135 = arith.addf %131, %134 : vector<16x32xf32>
    %cst_96 = arith.constant 0.000000e+00 : f32
    %136 = vector.broadcast %cst_96 : f32 to vector<16x32xf32>
    %137 = arith.maximumf %135, %136 : vector<16x32xf32>
    %c3_97 = arith.constant 3 : index
    %c0_98 = arith.constant 0 : index
    %c0_99 = arith.constant 0 : index
    %138 = vector.load %arg5[%c3_97, %c0_98, %c0_99] : memref<4x32x16xf32, #tpu.memory_space<vmem>>, vector<1x32x16xf32>
    %139 = vector.shape_cast %138 : vector<1x32x16xf32> to vector<32x16xf32>
    %140 = arith.truncf %137 : vector<16x32xf32> to vector<16x32xbf16>
    %141 = arith.truncf %139 : vector<32x16xf32> to vector<32x16xbf16>
    %cst_100 = arith.constant dense<0.000000e+00> : vector<16x16xf32>
    %142 = tpu.matmul %140, %141, %cst_100 {dimension_numbers = #tpu.dot_dimension_numbers<[1], [0], [0], [1], [0, 0, 1, 1], [], []>} : vector<16x32xbf16>, vector<32x16xbf16>, vector<16x16xf32> -> vector<16x16xf32>
    %143 = arith.truncf %121 : vector<16x16xf32> to vector<16x16xbf16>
    %144 = arith.truncf %142 : vector<16x16xf32> to vector<16x16xbf16>
    %cst_101 = arith.constant dense<0.000000e+00> : vector<16x16xf32>
    %145 = tpu.matmul %143, %144, %cst_101 {dimension_numbers = #tpu.dot_dimension_numbers<[1], [0], [0], [1], [0, 0, 1, 1], [], []>} : vector<16x16xbf16>, vector<16x16xbf16>, vector<16x16xf32> -> vector<16x16xf32>
    %c3_102 = arith.constant 3 : index
    %c0_103 = arith.constant 0 : index
    %c0_104 = arith.constant 0 : index
    %146 = vector.load %arg6[%c3_102, %c0_103, %c0_104] : memref<4x1x16xf32, #tpu.memory_space<vmem>>, vector<1x1x16xf32>
    %147 = vector.shape_cast %146 : vector<1x1x16xf32> to vector<1x16xf32>
    %148 = vector.broadcast %147 : vector<1x16xf32> to vector<16x16xf32>
    %149 = arith.addf %145, %148 : vector<16x16xf32>
    %150 = arith.mulf %149, %149 : vector<16x16xf32>
    %cst_105 = arith.constant dense<0.000000e+00> : vector<16xf32>
    %151 = vector.multi_reduction <add>, %150, %cst_105 [1] : vector<16x16xf32> to vector<16xf32>
    %152 = vector.shape_cast %151 : vector<16xf32> to vector<16x1xf32>
    %cst_106 = arith.constant 1.000000e-24 : f32
    %153 = vector.broadcast %cst_106 : f32 to vector<16x1xf32>
    %154 = arith.maximumf %152, %153 : vector<16x1xf32>
    %155 = math.rsqrt %154 : vector<16x1xf32>
    %156 = vector.broadcast %155 : vector<16x1xf32> to vector<16x16xf32>
    %157 = arith.mulf %149, %156 : vector<16x16xf32>
    %158 = tpu.concatenate %43, %81, %119, %157 in 0 : vector<16x16xf32>, vector<16x16xf32>, vector<16x16xf32>, vector<16x16xf32> -> vector<64x16xf32>
    %159 = arith.truncf %158 : vector<64x16xf32> to vector<64x16xbf16>
    %160 = arith.truncf %0 : vector<16x48xf32> to vector<16x48xbf16>
    %cst_107 = arith.constant dense<0.000000e+00> : vector<64x48xf32>
    %161 = tpu.matmul %159, %160, %cst_107 {dimension_numbers = #tpu.dot_dimension_numbers<[1], [0], [0], [1], [0, 0, 1, 1], [], []>} : vector<64x16xbf16>, vector<16x48xbf16>, vector<64x48xf32> -> vector<64x48xf32>
    %162 = vector.broadcast %2 : vector<1x48xf32> to vector<64x48xf32>
    %163 = arith.addf %161, %162 : vector<64x48xf32>
    %cst_108 = arith.constant 0.000000e+00 : f32
    %164 = vector.broadcast %cst_108 : f32 to vector<16x16xf32>
    %165 = vector.extract_strided_slice %163 {offsets = [0, 0], sizes = [16, 48], strides = [1, 1]} : vector<64x48xf32> to vector<16x48xf32>
    %166 = arith.truncf %164 : vector<16x16xf32> to vector<16x16xbf16>
    %167 = arith.truncf %1 : vector<16x48xf32> to vector<16x48xbf16>
    %cst_109 = arith.constant dense<0.000000e+00> : vector<16x48xf32>
    %168 = tpu.matmul %166, %167, %cst_109 {dimension_numbers = #tpu.dot_dimension_numbers<[1], [0], [0], [1], [0, 0, 1, 1], [], []>} : vector<16x16xbf16>, vector<16x48xbf16>, vector<16x48xf32> -> vector<16x48xf32>
    %169 = vector.broadcast %3 : vector<1x48xf32> to vector<16x48xf32>
    %170 = arith.addf %168, %169 : vector<16x48xf32>
    %171 = vector.extract_strided_slice %165 {offsets = [0, 0], sizes = [16, 16], strides = [1, 1]} : vector<16x48xf32> to vector<16x16xf32>
    %172 = vector.extract_strided_slice %170 {offsets = [0, 0], sizes = [16, 16], strides = [1, 1]} : vector<16x48xf32> to vector<16x16xf32>
    %173 = arith.addf %171, %172 : vector<16x16xf32>
    %174 = arith.negf %173 : vector<16x16xf32>
    %175 = math.exp %174 : vector<16x16xf32>
    %cst_110 = arith.constant 1.000000e+00 : f32
    %176 = vector.broadcast %cst_110 : f32 to vector<16x16xf32>
    %177 = arith.addf %176, %175 : vector<16x16xf32>
    %178 = arith.divf %176, %177 : vector<16x16xf32>
    %179 = vector.extract_strided_slice %165 {offsets = [0, 16], sizes = [16, 16], strides = [1, 1]} : vector<16x48xf32> to vector<16x16xf32>
    %180 = vector.extract_strided_slice %170 {offsets = [0, 16], sizes = [16, 16], strides = [1, 1]} : vector<16x48xf32> to vector<16x16xf32>
    %181 = arith.addf %179, %180 : vector<16x16xf32>
    %182 = arith.negf %181 : vector<16x16xf32>
    %183 = math.exp %182 : vector<16x16xf32>
    %cst_111 = arith.constant 1.000000e+00 : f32
    %184 = vector.broadcast %cst_111 : f32 to vector<16x16xf32>
    %185 = arith.addf %184, %183 : vector<16x16xf32>
    %186 = arith.divf %184, %185 : vector<16x16xf32>
    %187 = vector.extract_strided_slice %165 {offsets = [0, 32], sizes = [16, 16], strides = [1, 1]} : vector<16x48xf32> to vector<16x16xf32>
    %188 = vector.extract_strided_slice %170 {offsets = [0, 32], sizes = [16, 16], strides = [1, 1]} : vector<16x48xf32> to vector<16x16xf32>
    %189 = arith.mulf %178, %188 : vector<16x16xf32>
    %190 = arith.addf %187, %189 : vector<16x16xf32>
    %191 = math.tanh %190 : vector<16x16xf32>
    %cst_112 = arith.constant 1.000000e+00 : f32
    %192 = vector.broadcast %cst_112 : f32 to vector<16x16xf32>
    %193 = arith.subf %192, %186 : vector<16x16xf32>
    %194 = arith.mulf %193, %191 : vector<16x16xf32>
    %195 = arith.mulf %186, %164 : vector<16x16xf32>
    %196 = arith.addf %194, %195 : vector<16x16xf32>
    %cst_113 = arith.constant dense<0.000000e+00> : vector<16xf32>
    %197 = vector.multi_reduction <add>, %196, %cst_113 [1] : vector<16x16xf32> to vector<16xf32>
    %198 = vector.shape_cast %197 : vector<16xf32> to vector<16x1xf32>
    %cst_114 = arith.constant 1.600000e+01 : f32
    %199 = vector.broadcast %cst_114 : f32 to vector<16x1xf32>
    %200 = arith.divf %198, %199 : vector<16x1xf32>
    %201 = vector.broadcast %200 : vector<16x1xf32> to vector<16x16xf32>
    %202 = arith.subf %196, %201 : vector<16x16xf32>
    %203 = arith.mulf %202, %202 : vector<16x16xf32>
    %cst_115 = arith.constant dense<0.000000e+00> : vector<16xf32>
    %204 = vector.multi_reduction <add>, %203, %cst_115 [1] : vector<16x16xf32> to vector<16xf32>
    %205 = vector.shape_cast %204 : vector<16xf32> to vector<16x1xf32>
    %cst_116 = arith.constant 1.600000e+01 : f32
    %206 = vector.broadcast %cst_116 : f32 to vector<16x1xf32>
    %207 = arith.divf %205, %206 : vector<16x1xf32>
    %208 = vector.broadcast %200 : vector<16x1xf32> to vector<16x16xf32>
    %209 = arith.subf %196, %208 : vector<16x16xf32>
    %cst_117 = arith.constant 9.99999974E-6 : f32
    %210 = vector.broadcast %cst_117 : f32 to vector<16x1xf32>
    %211 = arith.addf %207, %210 : vector<16x1xf32>
    %212 = math.rsqrt %211 : vector<16x1xf32>
    %213 = vector.broadcast %212 : vector<16x1xf32> to vector<16x16xf32>
    %214 = arith.mulf %209, %213 : vector<16x16xf32>
    %215 = vector.broadcast %4 : vector<1x16xf32> to vector<16x16xf32>
    %216 = arith.mulf %214, %215 : vector<16x16xf32>
    %217 = vector.broadcast %5 : vector<1x16xf32> to vector<16x16xf32>
    %218 = arith.addf %216, %217 : vector<16x16xf32>
    %c0_118 = arith.constant 0 : index
    %c0_119 = arith.constant 0 : index
    %c0_120 = arith.constant 0 : index
    %219 = vector.load %arg13[%c0_118, %c0_119, %c0_120] : memref<4x16x16xf32, #tpu.memory_space<vmem>>, vector<1x16x16xf32>
    %220 = vector.shape_cast %219 : vector<1x16x16xf32> to vector<16x16xf32>
    %221 = vector.shape_cast %218 : vector<16x16xf32> to vector<1x16x16xf32>
    tpu.vector_store %arg13[%c0_118, %c0_119, %c0_120], %221 {strides = array<i32>} : memref<4x16x16xf32, #tpu.memory_space<vmem>>, vector<1x16x16xf32>,
    %222 = vector.extract_strided_slice %163 {offsets = [16, 0], sizes = [16, 48], strides = [1, 1]} : vector<64x48xf32> to vector<16x48xf32>
    %223 = arith.truncf %196 : vector<16x16xf32> to vector<16x16xbf16>
    %224 = arith.truncf %1 : vector<16x48xf32> to vector<16x48xbf16>
    %cst_121 = arith.constant dense<0.000000e+00> : vector<16x48xf32>
    %225 = tpu.matmul %223, %224, %cst_121 {dimension_numbers = #tpu.dot_dimension_numbers<[1], [0], [0], [1], [0, 0, 1, 1], [], []>} : vector<16x16xbf16>, vector<16x48xbf16>, vector<16x48xf32> -> vector<16x48xf32>
    %226 = vector.broadcast %3 : vector<1x48xf32> to vector<16x48xf32>
    %227 = arith.addf %225, %226 : vector<16x48xf32>
    %228 = vector.extract_strided_slice %222 {offsets = [0, 0], sizes = [16, 16], strides = [1, 1]} : vector<16x48xf32> to vector<16x16xf32>
    %229 = vector.extract_strided_slice %227 {offsets = [0, 0], sizes = [16, 16], strides = [1, 1]} : vector<16x48xf32> to vector<16x16xf32>
    %230 = arith.addf %228, %229 : vector<16x16xf32>
    %231 = arith.negf %230 : vector<16x16xf32>
    %232 = math.exp %231 : vector<16x16xf32>
    %cst_122 = arith.constant 1.000000e+00 : f32
    %233 = vector.broadcast %cst_122 : f32 to vector<16x16xf32>
    %234 = arith.addf %233, %232 : vector<16x16xf32>
    %235 = arith.divf %233, %234 : vector<16x16xf32>
    %236 = vector.extract_strided_slice %222 {offsets = [0, 16], sizes = [16, 16], strides = [1, 1]} : vector<16x48xf32> to vector<16x16xf32>
    %237 = vector.extract_strided_slice %227 {offsets = [0, 16], sizes = [16, 16], strides = [1, 1]} : vector<16x48xf32> to vector<16x16xf32>
    %238 = arith.addf %236, %237 : vector<16x16xf32>
    %239 = arith.negf %238 : vector<16x16xf32>
    %240 = math.exp %239 : vector<16x16xf32>
    %cst_123 = arith.constant 1.000000e+00 : f32
    %241 = vector.broadcast %cst_123 : f32 to vector<16x16xf32>
    %242 = arith.addf %241, %240 : vector<16x16xf32>
    %243 = arith.divf %241, %242 : vector<16x16xf32>
    %244 = vector.extract_strided_slice %222 {offsets = [0, 32], sizes = [16, 16], strides = [1, 1]} : vector<16x48xf32> to vector<16x16xf32>
    %245 = vector.extract_strided_slice %227 {offsets = [0, 32], sizes = [16, 16], strides = [1, 1]} : vector<16x48xf32> to vector<16x16xf32>
    %246 = arith.mulf %235, %245 : vector<16x16xf32>
    %247 = arith.addf %244, %246 : vector<16x16xf32>
    %248 = math.tanh %247 : vector<16x16xf32>
    %cst_124 = arith.constant 1.000000e+00 : f32
    %249 = vector.broadcast %cst_124 : f32 to vector<16x16xf32>
    %250 = arith.subf %249, %243 : vector<16x16xf32>
    %251 = arith.mulf %250, %248 : vector<16x16xf32>
    %252 = arith.mulf %243, %196 : vector<16x16xf32>
    %253 = arith.addf %251, %252 : vector<16x16xf32>
    %cst_125 = arith.constant dense<0.000000e+00> : vector<16xf32>
    %254 = vector.multi_reduction <add>, %253, %cst_125 [1] : vector<16x16xf32> to vector<16xf32>
    %255 = vector.shape_cast %254 : vector<16xf32> to vector<16x1xf32>
    %cst_126 = arith.constant 1.600000e+01 : f32
    %256 = vector.broadcast %cst_126 : f32 to vector<16x1xf32>
    %257 = arith.divf %255, %256 : vector<16x1xf32>
    %258 = vector.broadcast %257 : vector<16x1xf32> to vector<16x16xf32>
    %259 = arith.subf %253, %258 : vector<16x16xf32>
    %260 = arith.mulf %259, %259 : vector<16x16xf32>
    %cst_127 = arith.constant dense<0.000000e+00> : vector<16xf32>
    %261 = vector.multi_reduction <add>, %260, %cst_127 [1] : vector<16x16xf32> to vector<16xf32>
    %262 = vector.shape_cast %261 : vector<16xf32> to vector<16x1xf32>
    %cst_128 = arith.constant 1.600000e+01 : f32
    %263 = vector.broadcast %cst_128 : f32 to vector<16x1xf32>
    %264 = arith.divf %262, %263 : vector<16x1xf32>
    %265 = vector.broadcast %257 : vector<16x1xf32> to vector<16x16xf32>
    %266 = arith.subf %253, %265 : vector<16x16xf32>
    %cst_129 = arith.constant 9.99999974E-6 : f32
    %267 = vector.broadcast %cst_129 : f32 to vector<16x1xf32>
    %268 = arith.addf %264, %267 : vector<16x1xf32>
    %269 = math.rsqrt %268 : vector<16x1xf32>
    %270 = vector.broadcast %269 : vector<16x1xf32> to vector<16x16xf32>
    %271 = arith.mulf %266, %270 : vector<16x16xf32>
    %272 = vector.broadcast %4 : vector<1x16xf32> to vector<16x16xf32>
    %273 = arith.mulf %271, %272 : vector<16x16xf32>
    %274 = vector.broadcast %5 : vector<1x16xf32> to vector<16x16xf32>
    %275 = arith.addf %273, %274 : vector<16x16xf32>
    %c1_130 = arith.constant 1 : index
    %c0_131 = arith.constant 0 : index
    %c0_132 = arith.constant 0 : index
    %276 = vector.load %arg13[%c1_130, %c0_131, %c0_132] : memref<4x16x16xf32, #tpu.memory_space<vmem>>, vector<1x16x16xf32>
    %277 = vector.shape_cast %276 : vector<1x16x16xf32> to vector<16x16xf32>
    %278 = vector.shape_cast %275 : vector<16x16xf32> to vector<1x16x16xf32>
    tpu.vector_store %arg13[%c1_130, %c0_131, %c0_132], %278 {strides = array<i32>} : memref<4x16x16xf32, #tpu.memory_space<vmem>>, vector<1x16x16xf32>,
    %279 = vector.extract_strided_slice %163 {offsets = [32, 0], sizes = [16, 48], strides = [1, 1]} : vector<64x48xf32> to vector<16x48xf32>
    %280 = arith.truncf %253 : vector<16x16xf32> to vector<16x16xbf16>
    %281 = arith.truncf %1 : vector<16x48xf32> to vector<16x48xbf16>
    %cst_133 = arith.constant dense<0.000000e+00> : vector<16x48xf32>
    %282 = tpu.matmul %280, %281, %cst_133 {dimension_numbers = #tpu.dot_dimension_numbers<[1], [0], [0], [1], [0, 0, 1, 1], [], []>} : vector<16x16xbf16>, vector<16x48xbf16>, vector<16x48xf32> -> vector<16x48xf32>
    %283 = vector.broadcast %3 : vector<1x48xf32> to vector<16x48xf32>
    %284 = arith.addf %282, %283 : vector<16x48xf32>
    %285 = vector.extract_strided_slice %279 {offsets = [0, 0], sizes = [16, 16], strides = [1, 1]} : vector<16x48xf32> to vector<16x16xf32>
    %286 = vector.extract_strided_slice %284 {offsets = [0, 0], sizes = [16, 16], strides = [1, 1]} : vector<16x48xf32> to vector<16x16xf32>
    %287 = arith.addf %285, %286 : vector<16x16xf32>
    %288 = arith.negf %287 : vector<16x16xf32>
    %289 = math.exp %288 : vector<16x16xf32>
    %cst_134 = arith.constant 1.000000e+00 : f32
    %290 = vector.broadcast %cst_134 : f32 to vector<16x16xf32>
    %291 = arith.addf %290, %289 : vector<16x16xf32>
    %292 = arith.divf %290, %291 : vector<16x16xf32>
    %293 = vector.extract_strided_slice %279 {offsets = [0, 16], sizes = [16, 16], strides = [1, 1]} : vector<16x48xf32> to vector<16x16xf32>
    %294 = vector.extract_strided_slice %284 {offsets = [0, 16], sizes = [16, 16], strides = [1, 1]} : vector<16x48xf32> to vector<16x16xf32>
    %295 = arith.addf %293, %294 : vector<16x16xf32>
    %296 = arith.negf %295 : vector<16x16xf32>
    %297 = math.exp %296 : vector<16x16xf32>
    %cst_135 = arith.constant 1.000000e+00 : f32
    %298 = vector.broadcast %cst_135 : f32 to vector<16x16xf32>
    %299 = arith.addf %298, %297 : vector<16x16xf32>
    %300 = arith.divf %298, %299 : vector<16x16xf32>
    %301 = vector.extract_strided_slice %279 {offsets = [0, 32], sizes = [16, 16], strides = [1, 1]} : vector<16x48xf32> to vector<16x16xf32>
    %302 = vector.extract_strided_slice %284 {offsets = [0, 32], sizes = [16, 16], strides = [1, 1]} : vector<16x48xf32> to vector<16x16xf32>
    %303 = arith.mulf %292, %302 : vector<16x16xf32>
    %304 = arith.addf %301, %303 : vector<16x16xf32>
    %305 = math.tanh %304 : vector<16x16xf32>
    %cst_136 = arith.constant 1.000000e+00 : f32
    %306 = vector.broadcast %cst_136 : f32 to vector<16x16xf32>
    %307 = arith.subf %306, %300 : vector<16x16xf32>
    %308 = arith.mulf %307, %305 : vector<16x16xf32>
    %309 = arith.mulf %300, %253 : vector<16x16xf32>
    %310 = arith.addf %308, %309 : vector<16x16xf32>
    %cst_137 = arith.constant dense<0.000000e+00> : vector<16xf32>
    %311 = vector.multi_reduction <add>, %310, %cst_137 [1] : vector<16x16xf32> to vector<16xf32>
    %312 = vector.shape_cast %311 : vector<16xf32> to vector<16x1xf32>
    %cst_138 = arith.constant 1.600000e+01 : f32
    %313 = vector.broadcast %cst_138 : f32 to vector<16x1xf32>
    %314 = arith.divf %312, %313 : vector<16x1xf32>
    %315 = vector.broadcast %314 : vector<16x1xf32> to vector<16x16xf32>
    %316 = arith.subf %310, %315 : vector<16x16xf32>
    %317 = arith.mulf %316, %316 : vector<16x16xf32>
    %cst_139 = arith.constant dense<0.000000e+00> : vector<16xf32>
    %318 = vector.multi_reduction <add>, %317, %cst_139 [1] : vector<16x16xf32> to vector<16xf32>
    %319 = vector.shape_cast %318 : vector<16xf32> to vector<16x1xf32>
    %cst_140 = arith.constant 1.600000e+01 : f32
    %320 = vector.broadcast %cst_140 : f32 to vector<16x1xf32>
    %321 = arith.divf %319, %320 : vector<16x1xf32>
    %322 = vector.broadcast %314 : vector<16x1xf32> to vector<16x16xf32>
    %323 = arith.subf %310, %322 : vector<16x16xf32>
    %cst_141 = arith.constant 9.99999974E-6 : f32
    %324 = vector.broadcast %cst_141 : f32 to vector<16x1xf32>
    %325 = arith.addf %321, %324 : vector<16x1xf32>
    %326 = math.rsqrt %325 : vector<16x1xf32>
    %327 = vector.broadcast %326 : vector<16x1xf32> to vector<16x16xf32>
    %328 = arith.mulf %323, %327 : vector<16x16xf32>
    %329 = vector.broadcast %4 : vector<1x16xf32> to vector<16x16xf32>
    %330 = arith.mulf %328, %329 : vector<16x16xf32>
    %331 = vector.broadcast %5 : vector<1x16xf32> to vector<16x16xf32>
    %332 = arith.addf %330, %331 : vector<16x16xf32>
    %c2_142 = arith.constant 2 : index
    %c0_143 = arith.constant 0 : index
    %c0_144 = arith.constant 0 : index
    %333 = vector.load %arg13[%c2_142, %c0_143, %c0_144] : memref<4x16x16xf32, #tpu.memory_space<vmem>>, vector<1x16x16xf32>
    %334 = vector.shape_cast %333 : vector<1x16x16xf32> to vector<16x16xf32>
    %335 = vector.shape_cast %332 : vector<16x16xf32> to vector<1x16x16xf32>
    tpu.vector_store %arg13[%c2_142, %c0_143, %c0_144], %335 {strides = array<i32>} : memref<4x16x16xf32, #tpu.memory_space<vmem>>, vector<1x16x16xf32>,
    %336 = vector.extract_strided_slice %163 {offsets = [48, 0], sizes = [16, 48], strides = [1, 1]} : vector<64x48xf32> to vector<16x48xf32>
    %337 = arith.truncf %310 : vector<16x16xf32> to vector<16x16xbf16>
    %338 = arith.truncf %1 : vector<16x48xf32> to vector<16x48xbf16>
    %cst_145 = arith.constant dense<0.000000e+00> : vector<16x48xf32>
    %339 = tpu.matmul %337, %338, %cst_145 {dimension_numbers = #tpu.dot_dimension_numbers<[1], [0], [0], [1], [0, 0, 1, 1], [], []>} : vector<16x16xbf16>, vector<16x48xbf16>, vector<16x48xf32> -> vector<16x48xf32>
    %340 = vector.broadcast %3 : vector<1x48xf32> to vector<16x48xf32>
    %341 = arith.addf %339, %340 : vector<16x48xf32>
    %342 = vector.extract_strided_slice %336 {offsets = [0, 0], sizes = [16, 16], strides = [1, 1]} : vector<16x48xf32> to vector<16x16xf32>
    %343 = vector.extract_strided_slice %341 {offsets = [0, 0], sizes = [16, 16], strides = [1, 1]} : vector<16x48xf32> to vector<16x16xf32>
    %344 = arith.addf %342, %343 : vector<16x16xf32>
    %345 = arith.negf %344 : vector<16x16xf32>
    %346 = math.exp %345 : vector<16x16xf32>
    %cst_146 = arith.constant 1.000000e+00 : f32
    %347 = vector.broadcast %cst_146 : f32 to vector<16x16xf32>
    %348 = arith.addf %347, %346 : vector<16x16xf32>
    %349 = arith.divf %347, %348 : vector<16x16xf32>
    %350 = vector.extract_strided_slice %336 {offsets = [0, 16], sizes = [16, 16], strides = [1, 1]} : vector<16x48xf32> to vector<16x16xf32>
    %351 = vector.extract_strided_slice %341 {offsets = [0, 16], sizes = [16, 16], strides = [1, 1]} : vector<16x48xf32> to vector<16x16xf32>
    %352 = arith.addf %350, %351 : vector<16x16xf32>
    %353 = arith.negf %352 : vector<16x16xf32>
    %354 = math.exp %353 : vector<16x16xf32>
    %cst_147 = arith.constant 1.000000e+00 : f32
    %355 = vector.broadcast %cst_147 : f32 to vector<16x16xf32>
    %356 = arith.addf %355, %354 : vector<16x16xf32>
    %357 = arith.divf %355, %356 : vector<16x16xf32>
    %358 = vector.extract_strided_slice %336 {offsets = [0, 32], sizes = [16, 16], strides = [1, 1]} : vector<16x48xf32> to vector<16x16xf32>
    %359 = vector.extract_strided_slice %341 {offsets = [0, 32], sizes = [16, 16], strides = [1, 1]} : vector<16x48xf32> to vector<16x16xf32>
    %360 = arith.mulf %349, %359 : vector<16x16xf32>
    %361 = arith.addf %358, %360 : vector<16x16xf32>
    %362 = math.tanh %361 : vector<16x16xf32>
    %cst_148 = arith.constant 1.000000e+00 : f32
    %363 = vector.broadcast %cst_148 : f32 to vector<16x16xf32>
    %364 = arith.subf %363, %357 : vector<16x16xf32>
    %365 = arith.mulf %364, %362 : vector<16x16xf32>
    %366 = arith.mulf %357, %310 : vector<16x16xf32>
    %367 = arith.addf %365, %366 : vector<16x16xf32>
    %cst_149 = arith.constant dense<0.000000e+00> : vector<16xf32>
    %368 = vector.multi_reduction <add>, %367, %cst_149 [1] : vector<16x16xf32> to vector<16xf32>
    %369 = vector.shape_cast %368 : vector<16xf32> to vector<16x1xf32>
    %cst_150 = arith.constant 1.600000e+01 : f32
    %370 = vector.broadcast %cst_150 : f32 to vector<16x1xf32>
    %371 = arith.divf %369, %370 : vector<16x1xf32>
    %372 = vector.broadcast %371 : vector<16x1xf32> to vector<16x16xf32>
    %373 = arith.subf %367, %372 : vector<16x16xf32>
    %374 = arith.mulf %373, %373 : vector<16x16xf32>
    %cst_151 = arith.constant dense<0.000000e+00> : vector<16xf32>
    %375 = vector.multi_reduction <add>, %374, %cst_151 [1] : vector<16x16xf32> to vector<16xf32>
    %376 = vector.shape_cast %375 : vector<16xf32> to vector<16x1xf32>
    %cst_152 = arith.constant 1.600000e+01 : f32
    %377 = vector.broadcast %cst_152 : f32 to vector<16x1xf32>
    %378 = arith.divf %376, %377 : vector<16x1xf32>
    %379 = vector.broadcast %371 : vector<16x1xf32> to vector<16x16xf32>
    %380 = arith.subf %367, %379 : vector<16x16xf32>
    %cst_153 = arith.constant 9.99999974E-6 : f32
    %381 = vector.broadcast %cst_153 : f32 to vector<16x1xf32>
    %382 = arith.addf %378, %381 : vector<16x1xf32>
    %383 = math.rsqrt %382 : vector<16x1xf32>
    %384 = vector.broadcast %383 : vector<16x1xf32> to vector<16x16xf32>
    %385 = arith.mulf %380, %384 : vector<16x16xf32>
    %386 = vector.broadcast %4 : vector<1x16xf32> to vector<16x16xf32>
    %387 = arith.mulf %385, %386 : vector<16x16xf32>
    %388 = vector.broadcast %5 : vector<1x16xf32> to vector<16x16xf32>
    %389 = arith.addf %387, %388 : vector<16x16xf32>
    %c3_154 = arith.constant 3 : index
    %c0_155 = arith.constant 0 : index
    %c0_156 = arith.constant 0 : index
    %390 = vector.load %arg13[%c3_154, %c0_155, %c0_156] : memref<4x16x16xf32, #tpu.memory_space<vmem>>, vector<1x16x16xf32>
    %391 = vector.shape_cast %390 : vector<1x16x16xf32> to vector<16x16xf32>
    %392 = vector.shape_cast %389 : vector<16x16xf32> to vector<1x16x16xf32>
    tpu.vector_store %arg13[%c3_154, %c0_155, %c0_156], %392 {strides = array<i32>} : memref<4x16x16xf32, #tpu.memory_space<vmem>>, vector<1x16x16xf32>,
    return
  }
  func.func @transform_0(%arg0: i32) -> (i32, i32, i32) {
    %c0_i32 = arith.constant 0 : i32
    %c0_i32_0 = arith.constant 0 : i32
    %c0_i32_1 = arith.constant 0 : i32
    %c0_i32_2 = arith.constant 0 : i32
    return %c0_i32, %c0_i32_0, %c0_i32_1 : i32, i32, i32
  }
  func.func @transform_1(%arg0: i32) -> (i32, i32, i32) {
    %c0_i32 = arith.constant 0 : i32
    %c0_i32_0 = arith.constant 0 : i32
    %c0_i32_1 = arith.constant 0 : i32
    %c0_i32_2 = arith.constant 0 : i32
    return %c0_i32, %c0_i32_0, %c0_i32_1 : i32, i32, i32
  }
  func.func @transform_2(%arg0: i32) -> (i32, i32, i32) {
    %c0_i32 = arith.constant 0 : i32
    %c0_i32_0 = arith.constant 0 : i32
    %c0_i32_1 = arith.constant 0 : i32
    %c0_i32_2 = arith.constant 0 : i32
    return %c0_i32, %c0_i32_0, %c0_i32_1 : i32, i32, i32
  }
  func.func @transform_3(%arg0: i32) -> (i32, i32, i32) {
    %c0_i32 = arith.constant 0 : i32
    %c0_i32_0 = arith.constant 0 : i32
    %c0_i32_1 = arith.constant 0 : i32
    %c0_i32_2 = arith.constant 0 : i32
    return %c0_i32, %c0_i32_0, %c0_i32_1 : i32, i32, i32
  }
  func.func @transform_4(%arg0: i32) -> (i32, i32, i32) {
    %c0_i32 = arith.constant 0 : i32
    %c0_i32_0 = arith.constant 0 : i32
    %c0_i32_1 = arith.constant 0 : i32
    %c0_i32_2 = arith.constant 0 : i32
    return %c0_i32, %c0_i32_0, %c0_i32_1 : i32, i32, i32
  }
  func.func @transform_5(%arg0: i32) -> (i32, i32, i32) {
    %c0_i32 = arith.constant 0 : i32
    %c0_i32_0 = arith.constant 0 : i32
    %c0_i32_1 = arith.constant 0 : i32
    %c0_i32_2 = arith.constant 0 : i32
    return %c0_i32, %c0_i32_0, %c0_i32_1 : i32, i32, i32
  }
  func.func @transform_6(%arg0: i32) -> (i32, i32) {
    %c0_i32 = arith.constant 0 : i32
    %c0_i32_0 = arith.constant 0 : i32
    %c0_i32_1 = arith.constant 0 : i32
    return %c0_i32, %c0_i32_0 : i32, i32
  }
  func.func @transform_7(%arg0: i32) -> (i32, i32) {
    %c0_i32 = arith.constant 0 : i32
    %c0_i32_0 = arith.constant 0 : i32
    %c0_i32_1 = arith.constant 0 : i32
    return %c0_i32, %c0_i32_0 : i32, i32
  }
  func.func @transform_8(%arg0: i32) -> (i32, i32) {
    %c0_i32 = arith.constant 0 : i32
    %c0_i32_0 = arith.constant 0 : i32
    %c0_i32_1 = arith.constant 0 : i32
    return %c0_i32, %c0_i32_0 : i32, i32
  }
  func.func @transform_9(%arg0: i32) -> (i32, i32) {
    %c0_i32 = arith.constant 0 : i32
    %c0_i32_0 = arith.constant 0 : i32
    %c0_i32_1 = arith.constant 0 : i32
    return %c0_i32, %c0_i32_0 : i32, i32
  }
  func.func @transform_10(%arg0: i32) -> (i32, i32) {
    %c0_i32 = arith.constant 0 : i32
    %c0_i32_0 = arith.constant 0 : i32
    %c0_i32_1 = arith.constant 0 : i32
    return %c0_i32, %c0_i32_0 : i32, i32
  }
  func.func @transform_11(%arg0: i32) -> (i32, i32) {
    %c0_i32 = arith.constant 0 : i32
    %c0_i32_0 = arith.constant 0 : i32
    %c0_i32_1 = arith.constant 0 : i32
    return %c0_i32, %c0_i32_0 : i32, i32
  }
  func.func @transform_12(%arg0: i32) -> (i32, i32, i32) {
    %c0_i32 = arith.constant 0 : i32
    %c0_i32_0 = arith.constant 0 : i32
    %c0_i32_1 = arith.constant 0 : i32
    %c0_i32_2 = arith.constant 0 : i32
    return %c0_i32, %c0_i32_0, %c0_i32_1 : i32, i32, i32
  }
}

</mosaic_0001>

<bundles_post_ra>
// kernel: gcrn_forward.1
= control target key start
LH: loop header
LB: loop body
LE: loop exit
PB: predicated region body
PF: predicated region fallthrough
CT: control target
= control target key end

     0   :  { %vm62_vm0 = vcmask 1043456   ;;  %v2093_v3 = vmov 0.0   ;;  %vm2094_vm1 = vmmov 0   ;;  %s2670_s0 = inlined_call_operand.vmem [shape: f32[4,16,8], index: 0, kind: input, shape index: {}]   ;;  %s2671_s1 = inlined_call_operand.vmem [shape: f32[4,16,16], index: 1, kind: input, shape index: {}]   ;;  %s2672_s2 = inlined_call_operand.vmem [shape: f32[4,8,32], index: 2, kind: input, shape index: {}]   ;;  %s2673_s3 = inlined_call_operand.vmem [shape: f32[4,1,32], index: 3, kind: input, shape index: {}]   ;;  %s2674_s4 = inlined_call_operand.vmem [shape: f32[4,32,16], index: 4, kind: input, shape index: {}]   ;;  %s2675_s5 = inlined_call_operand.vmem [shape: f32[4,1,16], index: 5, kind: input, shape index: {}]   ;;  %s2676_s6 = inlined_call_operand.vmem [shape: f32[16,48], index: 6, kind: input, shape index: {}]   ;;  %s2677_s7 = inlined_call_operand.vmem [shape: f32[16,48], index: 7, kind: input, shape index: {}]   ;;  %s2678_s8 = inlined_call_operand.vmem [shape: f32[1,48], index: 8, kind: input, shape index: {}]   ;;  %s2679_s9 = inlined_call_operand.vmem [shape: f32[1,48], index: 9, kind: input, shape index: {}]   ;;  %s2680_s10 = inlined_call_operand.vmem [shape: f32[1,16], index: 10, kind: input, shape index: {}]   ;;  %s2681_s11 = inlined_call_operand.vmem [shape: f32[1,16], index: 11, kind: input, shape index: {}]   ;;  %s2682_s12 = inlined_call_operand.hbm [shape: f32[4,16,16], index: 12, kind: output, shape index: {}]  }
   0x1   :  { %v55_v0 = vld [vmem:[%s2672_s2] sm:$0xff]  ;;  %v54_v2 = vld [vmem:[%s2670_s0 + $0x8] sm:$0xff]  ;;  %1841 = vmatprep.subr.bf16.mxu0 %v2093_v3  ;;  %1843 = vmatprep.mubr.msk.bf16.mxu0 %vm2094_vm1, %v2093_v3 }
   0x2   :  { %v53_v1 = vld [vmem:[%s2670_s0] sm:$0xff]  ;;  %v57_v4 = vpack.c.bf16 %v55_v0, %v55_v0 }
   0x3   :  { %17 = vsyncpa [#allocation3], 0  ;;  %1847 = vmatprep.subr.bf16.mxu1 %v2093_v3  ;;  %1849 = vmatprep.mubr.msk.bf16.mxu1 %vm2094_vm1, %v2093_v3  ;;  %v56_v6 = vpack.c.bf16 %v54_v2, %v53_v1  ;;  %vm58_vm2 = vcmask 64512   ;;  %v51_v9 = vld [vmem:[%s2671_s1] sm:$0xff]  ;;  %v52_v10 = vld [vmem:[%s2671_s1 + $0x8] sm:$0xff]  ;;  %vm116_vm3 = vcmask 130048  }
   0x4   :  { %v64_v5 = vsel %vm62_vm0, %v57_v4, 0  ;;  %v107_v14 = vpack.c.bf16 %v52_v10, %v51_v9  ;;  %v163_v15 = vld [vmem:[%s2674_s4] sm:$0xff]  ;;  %v164_v16 = vld [vmem:[%s2674_s4 + $0x8] sm:$0xff]  ;;  %v165_v18 = vld [vmem:[%s2674_s4 + $0x10] sm:$0xff]  ;;  %vm170_vm4 = vcmask 261120   ;;  %s2096_s18 = smov 96  }
   0x5   :  { %1842 = vmatpush3.bf16.msra.mxu0 %v64_v5  ;;  %v168_v17 = vpack.c.bf16 %v164_v16, %v163_v15  ;;  %v166_v19 = vld [vmem:[%s2674_s4 + $0x18] sm:$0xff]  ;;  %v1717_v21 = vld [vmem:[%s2673_s3] ss:$0 sm:$0xff]  ;;  %v1726_v23 = vld [vmem:[%s2672_s2 + $0x8] sm:$0xff] }
   0x6   :  { %1853 = vmatprep.subr.bf16.mxu0 %v2093_v3  ;;  %v169_v20 = vpack.c.bf16 %v166_v19, %v165_v18  ;;  %v287_v29 = vpack.c.bf16 %v1726_v23, %v1726_v23  ;;  %v1724_v34 = vld [vmem:[%s2670_s0 + $0x10] sm:$0xff]  ;;  %v1725_v35 = vld [vmem:[%s2670_s0 + $0x18] sm:$0xff]  ;;  %v1731_v50 = vld [vmem:[%s2674_s4 + $0x20] sm:$0xff] }
   0x7   :  { %v286_v36 = vpack.c.bf16 %v1725_v35, %v1724_v34  ;;  %v1722_v44 = vld [vmem:[%s2671_s1 + $0x10] sm:$0xff]  ;;  %v1723_v45 = vld [vmem:[%s2671_s1 + $0x18] sm:$0xff]  ;;  %v1732_v51 = vld [vmem:[%s2674_s4 + $0x28] sm:$0xff] }
   0x8   :  { %1844 = vmatmul.mubr.msk.bf16.vlgmr.msra.gmra.mrb[0].mxu0 %vm58_vm2, %v56_v6  ;;  %v292_v33 = vsel %vm62_vm0, %v287_v29, 0  ;;  %v335_v49 = vpack.c.bf16 %v1723_v45, %v1722_v44  ;;  %v397_v52 = vpack.c.bf16 %v1732_v51, %v1731_v50  ;;  %v1733_v53 = vld [vmem:[%s2674_s4 + $0x30] sm:$0xff]  ;;  %v1734_v54 = vld [vmem:[%s2674_s4 + $0x38] sm:$0xff]  ;;  %v1720_v56 = vld [vmem:[%s2675_s5] ss:$0 sm:$0xff] }
   0x9   :  { %1857 = vmatprep.mubr.msk.bf16.mxu0 %vm2094_vm1, %v2093_v3  ;;  %1854 = vmatpush3.bf16.msra.mxu0 %v168_v17  ;;  %v398_v55 = vpack.c.bf16 %v1734_v54, %v1733_v53  ;;  %v1729_v2 = vld [vmem:[%s2673_s3 + $0x1] ss:$0 sm:$0xff]  ;;  %v1743_v5 = vld [vmem:[%s2672_s2 + $0x10] sm:$0xff]  ;;  %v1742_v18 = vld [vmem:[%s2670_s0 + $0x28] sm:$0xff] }
   0xa   :  { %1855 = vmatprep.subr.bf16.mxu0 %v2093_v3  ;;  %v1741_v17 = vld [vmem:[%s2670_s0 + $0x20] sm:$0xff]  ;;  %v1749_v34 = vld [vmem:[%s2674_s4 + $0x48] sm:$0xff]  ;;  %v1760_v51 = vld [vmem:[%s2672_s2 + $0x18] sm:$0xff] }
   0xb   :  { %v515_v19 = vpack.c.bf16 %v1742_v18, %v1741_v17  ;;  %v1765_v18 = vld [vmem:[%s2674_s4 + $0x60] sm:$0xff] }
   0xd   :  { %1856 = vmatpush3.bf16.msra.mxu0 %v169_v20 }
   0xe   :  { %1867 = vmatprep.subr.bf16.mxu0 %v2093_v3 }
  0xdb   :  { %v100_v7 = vpop.f32.mrb[0].mxu0 }
  0xdc   :  { %v1845_v8 = vpop.f32.mrb[1].mxu0 }
  0xdd   :  { %v103_v11 = vpop.f32.mrb[2].mxu0 }
  0xde   :  { %v108_v12 = vpack.c.bf16 %v103_v11, %v100_v7  ;;  %v1846_v13 = vpop.f32.mrb[3].mxu0 }
  0xe0   :  { %1848 = vmatpush3.bf16.msra.mxu1 %v108_v12  ;;  %v516_v12 = vpack.c.bf16 %v1743_v5, %v1743_v5 }
  0xe1   :  { %1861 = vmatprep.subr.bf16.mxu1 %v2093_v3 }
  0xe2   :  { %v521_v16 = vsel %vm62_vm0, %v516_v12, 0  ;;  %v1756_v12 = vld [vmem:[%s2671_s1 + $0x30] sm:$0xff] }
  0xe3   :  { %1850 = vmatmul.mubr.msk.bf16.vlgmr.msra.gmra.mrb[0].mxu1 %vm116_vm3, %v107_v14 }
  0xe4   :  { %1863 = vmatprep.mubr.msk.bf16.mxu1 %vm2094_vm1, %v2093_v3 }
 0x1b6   :  { %v154_v22 = vpop.f32.mrb[0].mxu1 }
 0x1b7   :  { %v155_v24 = vadd.f32 %v1717_v21, %v154_v22  ;;  %v1851_v25 = vpop.f32.mrb[1].mxu1 }
 0x1b8   :  { %v157_v26 = vpop.f32.mrb[2].mxu1 }
 0x1b9   :  { %v158_v27 = vadd.f32 %v1717_v21, %v157_v26  ;;  %v1852_v28 = vpop.f32.mrb[3].mxu1  ;;  %v161_v30 = vmax.f32 %v155_v24, 0.0 }
 0x1ba   :  { %v1740_v28 = vld [vmem:[%s2671_s1 + $0x28] sm:$0xff] }
 0x1bb   :  { %v162_v31 = vmax.f32 %v158_v27, 0.0  ;;  %v1739_v27 = vld [vmem:[%s2671_s1 + $0x20] sm:$0xff] }
 0x1bd   :  { %v167_v32 = vpack.c.bf16 %v162_v31, %v161_v30 }
 0x1bf   :  { %1858 = vmatmul.mubr.msk.bf16.vlgmr.msra.gmra.mrb[4].mxu0 %vm170_vm4, %v167_v32  ;;  %v564_v32 = vpack.c.bf16 %v1740_v28, %v1739_v27 }
 0x1c0   :  { %1868 = vmatpush3.bf16.msra.mxu0 %v292_v33  ;;  %1869 = vmatprep.mubr.msk.bf16.mxu0 %vm2094_vm1, %v2093_v3  ;;  %v1748_v33 = vld [vmem:[%s2674_s4 + $0x40] sm:$0xff] }
 0x1c1   :  { %1879 = vmatprep.subr.bf16.mxu0 %v2093_v3  ;;  %v626_v35 = vpack.c.bf16 %v1749_v34, %v1748_v33 }
 0x1c7   :  { %1870 = vmatmul.mubr.msk.bf16.vlgmr.msra.gmra.mrb[8].mxu0 %vm58_vm2, %v286_v36  ;;  %v1750_v36 = vld [vmem:[%s2674_s4 + $0x50] sm:$0xff] }
 0x1c8   :  { %1883 = vmatprep.mubr.msk.bf16.mxu0 %vm2094_vm1, %v2093_v3  ;;  %1880 = vmatpush3.bf16.msra.mxu0 %v397_v52 }
 0x1c9   :  { %1881 = vmatprep.subr.bf16.mxu0 %v2093_v3 }
 0x1cc   :  { %1882 = vmatpush3.bf16.msra.mxu0 %v398_v55 }
 0x1cd   :  { %1893 = vmatprep.subr.bf16.mxu0 %v2093_v3 }
 0x292   :  { %v208_v37 = vpop.f32.mrb[4].mxu0 }
 0x293   :  { %v1859_v38 = vpop.f32.mrb[5].mxu0 }
 0x294   :  { %v211_v39 = vpop.f32.mrb[6].mxu0 }
 0x295   :  { %v215_v40 = vpack.c.bf16 %v211_v39, %v208_v37  ;;  %v1860_v41 = vpop.f32.mrb[7].mxu0  ;;  %v1751_v37 = vld [vmem:[%s2674_s4 + $0x58] sm:$0xff]  ;;  %v1737_v39 = vld [vmem:[%s2675_s5 + $0x1] ss:$0 sm:$0xff] }
 0x296   :  { %v627_v38 = vpack.c.bf16 %v1751_v37, %v1750_v36 }
 0x297   :  { %1862 = vmatpush3.bf16.msra.mxu1 %v215_v40 }
 0x298   :  { %1873 = vmatprep.subr.bf16.mxu1 %v2093_v3 }
 0x29a   :  { %1864 = vmatmul.mubr.msk.bf16.vlgmr.msra.gmra.mrb[4].mxu1 %vm116_vm3, %v107_v14  ;;  %v328_v42 = vpop.f32.mrb[8].mxu0 }
 0x29b   :  { %v1871_v43 = vpop.f32.mrb[9].mxu0  ;;  %1875 = vmatprep.mubr.msk.bf16.mxu1 %vm2094_vm1, %v2093_v3 }
 0x29c   :  { %v331_v46 = vpop.f32.mrb[10].mxu0 }
 0x29d   :  { %v336_v47 = vpack.c.bf16 %v331_v46, %v328_v42  ;;  %v1872_v48 = vpop.f32.mrb[11].mxu0 }
 0x29f   :  { %1874 = vmatpush3.bf16.msra.mxu1 %v336_v47 }
 0x2a0   :  { %1887 = vmatprep.subr.bf16.mxu1 %v2093_v3 }
 0x2a2   :  { %1876 = vmatmul.mubr.msk.bf16.vlgmr.msra.gmra.mrb[8].mxu1 %vm116_vm3, %v335_v49 }
 0x2a3   :  { %1889 = vmatprep.mubr.msk.bf16.mxu1 %vm2094_vm1, %v2093_v3 }
 0x36d   :  { %v257_v57 = vpop.f32.mrb[4].mxu1 }
 0x36e   :  { %v2263_v58 = vadd.f32 %v1720_v56, %v257_v57  ;;  %v1865_v59 = vpop.f32.mrb[5].mxu1 }
 0x36f   :  { %v260_v60 = vpop.f32.mrb[6].mxu1  ;;  %v745_v59 = vpack.c.bf16 %v1760_v51, %v1760_v51 }
 0x370   :  { %v2265_v61 = vadd.f32 %v1720_v56, %v260_v60  ;;  %v1866_v62 = vpop.f32.mrb[7].mxu1  ;;  %v264_v63 = vmul.f32 %v2263_v58, %v2263_v58 }
 0x372   :  { %v266_v0 = vsel %vm116_vm3, %v264_v63, 0.0  ;;  %v265_v1 = vmul.f32 %v2265_v61, %v2265_v61 }
 0x373   :  { %267 = vadd.xlane.f32.xlu0 %v266_v0  ;;  %v750_v0 = vsel %vm62_vm0, %v745_v59, 0 }
 0x374   :  { %v269_v8 = vsel %vm116_vm3, %v265_v1, 0.0  ;;  %v1758_v1 = vld [vmem:[%s2670_s0 + $0x30] sm:$0xff] }
 0x375   :  { %v382_v4 = vpop.f32.mrb[8].mxu1 }
 0x376   :  { %v383_v6 = vadd.f32 %v1729_v2, %v382_v4  ;;  %v1877_v7 = vpop.f32.mrb[9].mxu1 }
 0x377   :  { %270 = vadd.xlane.f32.xlu0 %v269_v8  ;;  %v385_v9 = vpop.f32.mrb[10].mxu1 }
 0x378   :  { %v386_v10 = vadd.f32 %v1729_v2, %v385_v9  ;;  %v1878_v11 = vpop.f32.mrb[11].mxu1  ;;  %v389_v13 = vmax.f32 %v383_v6, 0.0  ;;  %v1759_v2 = vld [vmem:[%s2670_s0 + $0x38] sm:$0xff] }
 0x379   :  { %v744_v4 = vpack.c.bf16 %v1759_v2, %v1758_v1 }
 0x37a   :  { %v390_v14 = vmax.f32 %v386_v10, 0.0 }
 0x37c   :  { %v396_v15 = vpack.c.bf16 %v390_v14, %v389_v13  ;;  %v1757_v13 = vld [vmem:[%s2671_s1 + $0x38] sm:$0xff]  ;;  %s2099_s1 = smov 16  }
 0x37d   :  { %v2364_v17 = vpack.c.bf16 %v1757_v13, %v1756_v12 }
 0x37e   :  { %1884 = vmatmul.mubr.msk.bf16.vlgmr.msra.gmra.mrb[12].mxu0 %vm170_vm4, %v396_v15 }
 0x37f   :  { %1894 = vmatpush3.bf16.msra.mxu0 %v521_v16  ;;  %1895 = vmatprep.mubr.msk.bf16.mxu0 %vm2094_vm1, %v2093_v3 }
 0x380   :  { %1905 = vmatprep.subr.bf16.mxu0 %v2093_v3 }
 0x386   :  { %1896 = vmatmul.mubr.msk.bf16.vlgmr.msra.gmra.mrb[16].mxu0 %vm58_vm2, %v515_v19  ;;  %v1766_v19 = vld [vmem:[%s2674_s4 + $0x68] sm:$0xff] }
 0x387   :  { %1909 = vmatprep.mubr.msk.bf16.mxu0 %vm2094_vm1, %v2093_v3  ;;  %1906 = vmatpush3.bf16.msra.mxu0 %v626_v35 }
 0x388   :  { %1907 = vmatprep.subr.bf16.mxu0 %v2093_v3 }
 0x38b   :  { %1908 = vmatpush3.bf16.msra.mxu0 %v627_v38 }
 0x38c   :  { %1919 = vmatprep.subr.bf16.mxu0 %v2093_v3 }
 0x400   :  { %v268_v27 = vpop.xlane.xlu0 %267 }
 0x404   :  { %v271_v28 = vpop.xlane.xlu0 %270 }
 0x451   :  { %v436_v20 = vpop.f32.mrb[12].mxu0 }
 0x452   :  { %v1885_v21 = vpop.f32.mrb[13].mxu0 }
 0x453   :  { %v439_v22 = vpop.f32.mrb[14].mxu0  ;;  %v1767_v21 = vld [vmem:[%s2674_s4 + $0x70] sm:$0xff] }
 0x454   :  { %v443_v23 = vpack.c.bf16 %v439_v22, %v436_v20  ;;  %v1886_v24 = vpop.f32.mrb[15].mxu0  ;;  %v855_v20 = vpack.c.bf16 %v1766_v19, %v1765_v18  ;;  %v1768_v22 = vld [vmem:[%s2674_s4 + $0x78] sm:$0xff] }
 0x455   :  { %v43_v24 = vld [vmem:[%s2676_s6] sm:$0xff] }
 0x456   :  { %1888 = vmatpush3.bf16.msra.mxu1 %v443_v23  ;;  %v856_v23 = vpack.c.bf16 %v1768_v22, %v1767_v21  ;;  %v2451_v22 = vld [vmem:[%s2678_s8] ss:$0 sm:$0xff]  ;;  %s2097_s8 = smov 32  }
 0x457   :  { %1899 = vmatprep.subr.bf16.mxu1 %v2093_v3 }
 0x459   :  { %1890 = vmatmul.mubr.msk.bf16.vlgmr.msra.gmra.mrb[12].mxu1 %vm116_vm3, %v335_v49  ;;  %v557_v25 = vpop.f32.mrb[16].mxu0  ;;  %v1746_v49 = vld [vmem:[%s2673_s3 + $0x2] ss:$0 sm:$0xff] }
 0x45a   :  { %v1897_v26 = vpop.f32.mrb[17].mxu0  ;;  %1901 = vmatprep.mubr.msk.bf16.mxu1 %vm2094_vm1, %v2093_v3 }
 0x45b   :  { %v560_v29 = vpop.f32.mrb[18].mxu0 }
 0x45c   :  { %v565_v30 = vpack.c.bf16 %v560_v29, %v557_v25  ;;  %v1898_v31 = vpop.f32.mrb[19].mxu0  ;;  %v44_v25 = vld [vmem:[%s2676_s6 + $0x8] sm:$0xff] }
 0x45d   :  { %v969_v26 = vpack.c.bf16 %v44_v25, %v43_v24  ;;  %v272_v31 = vmax.f32 %v268_v27, 1e-24 }
 0x45e   :  { %1900 = vmatpush3.bf16.msra.mxu1 %v565_v30  ;;  %v273_v30 = vmax.f32 %v271_v28, 1e-24 }
 0x45f   :  { %1913 = vmatprep.subr.bf16.mxu1 %v2093_v3 }
 0x460   :  { %1989 = vrsqrt.f32 %v273_v30 }
 0x461   :  { %1902 = vmatmul.mubr.msk.bf16.vlgmr.msra.gmra.mrb[16].mxu1 %vm116_vm3, %v564_v32  ;;  %1991 = vrsqrt.f32 %v272_v31 }
 0x462   :  { %1915 = vmatprep.mubr.msk.bf16.mxu1 %vm2094_vm1, %v2093_v3 }
 0x52c   :  { %v486_v40 = vpop.f32.mrb[12].mxu1 }
 0x52d   :  { %v2324_v41 = vadd.f32 %v1737_v39, %v486_v40  ;;  %v1891_v42 = vpop.f32.mrb[13].mxu1 }
 0x52e   :  { %v489_v43 = vpop.f32.mrb[14].mxu1  ;;  %v1763_v42 = vld [vmem:[%s2673_s3 + $0x3] ss:$0 sm:$0xff] }
 0x52f   :  { %v2326_v44 = vadd.f32 %v1737_v39, %v489_v43  ;;  %v1892_v45 = vpop.f32.mrb[15].mxu1  ;;  %v493_v46 = vmul.f32 %v2324_v41, %v2324_v41 }
 0x530   :  { %v1990_v45 = vpop.eup %1989 }
 0x531   :  { %v495_v47 = vsel %vm116_vm3, %v493_v46, 0.0  ;;  %v494_v48 = vmul.f32 %v2326_v44, %v2326_v44 }
 0x532   :  { %496 = vadd.xlane.f32.xlu1 %v495_v47 }
 0x533   :  { %v498_v54 = vsel %vm116_vm3, %v494_v48, 0.0 }
 0x534   :  { %v611_v50 = vpop.f32.mrb[16].mxu1 }
 0x535   :  { %v612_v52 = vadd.f32 %v1746_v49, %v611_v50  ;;  %v1903_v53 = vpop.f32.mrb[17].mxu1 }
 0x536   :  { %499 = vadd.xlane.f32.xlu1 %v498_v54  ;;  %v614_v55 = vpop.f32.mrb[18].mxu1 }
 0x537   :  { %v615_v56 = vadd.f32 %v1746_v49, %v614_v55  ;;  %v1904_v57 = vpop.f32.mrb[19].mxu1  ;;  %v618_v60 = vmax.f32 %v612_v52, 0.0  ;;  %v1992_v49 = vpop.eup %1991  ;;  %v277_v52 = vmul.f32 %v1990_v45, %v2265_v61 }
 0x538   :  { %v276_v55 = vmul.f32 %v1992_v49, %v2263_v58  ;;  %v45_v58 = vld [vmem:[%s2677_s7] sm:$0xff] }
 0x539   :  { %v619_v62 = vmax.f32 %v615_v56, 0.0 }
 0x53a   :  { %v965_v59 = vpack.c.bf16 %v277_v52, %v276_v55 }
 0x53b   :  { %v625_v63 = vpack.c.bf16 %v619_v62, %v618_v60 }
 0x53d   :  { %1910 = vmatmul.mubr.msk.bf16.vlgmr.msra.gmra.mrb[20].mxu0 %vm170_vm4, %v625_v63 }
 0x53e   :  { %1920 = vmatpush3.bf16.msra.mxu0 %v750_v0  ;;  %1921 = vmatprep.mubr.msk.bf16.mxu0 %vm2094_vm1, %v2093_v3  ;;  %v46_v0 = vld [vmem:[%s2677_s7 + $0x8] sm:$0xff] }
 0x53f   :  { %1931 = vmatprep.subr.bf16.mxu0 %v2093_v3  ;;  %v2417_v1 = vpack.c.bf16 %v46_v0, %v45_v58 }
 0x545   :  { %1922 = vmatmul.mubr.msk.bf16.vlgmr.msra.gmra.mrb[24].mxu0 %vm58_vm2, %v744_v4 }
 0x546   :  { %1935 = vmatprep.mubr.msk.bf16.mxu0 %vm2094_vm1, %v2093_v3  ;;  %1932 = vmatpush3.bf16.msra.mxu0 %v855_v20 }
 0x547   :  { %1933 = vmatprep.subr.bf16.mxu0 %v2093_v3 }
 0x54a   :  { %1934 = vmatpush3.bf16.msra.mxu0 %v856_v23 }
 0x54b   :  { %1945 = vmatprep.subr.bf16.mxu0 %v969_v26 }
 0x5bf   :  { %v497_v29 = vpop.xlane.xlu1 %496 }
 0x5c0   :  { %v501_v40 = vmax.f32 %v497_v29, 1e-24 }
 0x5c3   :  { %v500_v33 = vpop.xlane.xlu1 %499 }
 0x5c4   :  { %v502_v37 = vmax.f32 %v500_v33, 1e-24 }
 0x5c6   :  { %1993 = vrsqrt.f32 %v502_v37 }
 0x5c7   :  { %1995 = vrsqrt.f32 %v501_v40 }
 0x5d0   :  { %v1994_v57 = vpop.eup %1993 }
 0x5d1   :  { %v1996_v60 = vpop.eup %1995  ;;  %v506_v62 = vmul.f32 %v1994_v57, %v2326_v44 }
 0x5d2   :  { %v505_v63 = vmul.f32 %v1996_v60, %v2324_v41 }
 0x5d4   :  { %v966_v61 = vpack.c.bf16 %v506_v62, %v505_v63 }
 0x610   :  { %v665_v5 = vpop.f32.mrb[20].mxu0 }
 0x611   :  { %v1911_v6 = vpop.f32.mrb[21].mxu0 }
 0x612   :  { %v668_v7 = vpop.f32.mrb[22].mxu0 }
 0x613   :  { %v672_v8 = vpack.c.bf16 %v668_v7, %v665_v5  ;;  %v1912_v9 = vpop.f32.mrb[23].mxu0 }
 0x615   :  { %1914 = vmatpush3.bf16.msra.mxu1 %v672_v8 }
 0x616   :  { %1925 = vmatprep.subr.bf16.mxu1 %v2093_v3 }
 0x618   :  { %1916 = vmatmul.mubr.msk.bf16.vlgmr.msra.gmra.mrb[20].mxu1 %vm116_vm3, %v564_v32  ;;  %v786_v10 = vpop.f32.mrb[24].mxu0  ;;  %v2393_v32 = vld [vmem:[%s2675_s5 + $0x2] ss:$0 sm:$0xff] }
 0x619   :  { %v1923_v11 = vpop.f32.mrb[25].mxu0  ;;  %1927 = vmatprep.mubr.msk.bf16.mxu1 %vm2094_vm1, %v2093_v3 }
 0x61a   :  { %v789_v14 = vpop.f32.mrb[26].mxu0 }
 0x61b   :  { %v794_v15 = vpack.c.bf16 %v789_v14, %v786_v10  ;;  %v1924_v16 = vpop.f32.mrb[27].mxu0  ;;  %v2095_v10 = vmov 0  }
 0x61d   :  { %1926 = vmatpush3.bf16.msra.mxu1 %v794_v15  ;;  %v2442_v15 = vld [vmem:[%s2679_s9] ss:$0 sm:$0xff]  ;;  %s2098_s9 = smov 112  }
 0x61e   :  { %1939 = vmatprep.subr.bf16.mxu1 %v2093_v3 }
 0x620   :  { %1928 = vmatmul.mubr.msk.bf16.vlgmr.msra.gmra.mrb[24].mxu1 %vm116_vm3, %v2364_v17 }
 0x621   :  { %1941 = vmatprep.mubr.msk.bf16.mxu1 %vm2094_vm1, %v2093_v3 }
 0x6eb   :  { %v715_v34 = vpop.f32.mrb[20].mxu1 }
 0x6ec   :  { %v2396_v35 = vadd.f32 %v2393_v32, %v715_v34  ;;  %v1917_v36 = vpop.f32.mrb[21].mxu1 }
 0x6ed   :  { %v2398_v38 = vpop.f32.mrb[22].mxu1 }
 0x6ee   :  { %v1918_v39 = vpop.f32.mrb[23].mxu1 }
 0x6f3   :  { %v840_v43 = vpop.f32.mrb[24].mxu1 }
 0x6f4   :  { %v841_v46 = vadd.f32 %v1763_v42, %v840_v43  ;;  %v1929_v47 = vpop.f32.mrb[25].mxu1 }
 0x6f5   :  { %v843_v48 = vpop.f32.mrb[26].mxu1 }
 0x6f6   :  { %v844_v50 = vadd.f32 %v1763_v42, %v843_v48  ;;  %v1930_v51 = vpop.f32.mrb[27].mxu1  ;;  %v847_v53 = vmax.f32 %v841_v46, 0.0 }
 0x6f8   :  { %v848_v54 = vmax.f32 %v844_v50, 0.0 }
 0x6fa   :  { %v854_v56 = vpack.c.bf16 %v848_v54, %v847_v53 }
 0x6fc   :  { %1936 = vmatmul.mubr.msk.bf16.vlgmr.msra.gmra.mrb[28].mxu0 %vm170_vm4, %v854_v56 }
 0x6fd   :  { %1947 = vmatprep.mubr.msk.bf16.mxu0 %vm116_vm3, %v965_v59  ;;  %1946 = vmatpush3.bf16.msra.mxu0 %v969_v26 }
 0x6fe   :  { %1967 = vmatprep.subr.bf16.mxu0 %v2093_v3 }
 0x704   :  { %1948 = vmatmul.mubr.msk.bf16.vlgmr.msra.gmra.mrb[32].mxu0 %vm116_vm3, %v966_v61 }
 0x705   :  { %1968 = vmatpush3.bf16.msra.mxu0 %v2417_v1 }
 0x7cf   :  { %v894_v44 = vpop.f32.mrb[28].mxu0 }
 0x7d0   :  { %v1937_v2 = vpop.f32.mrb[29].mxu0 }
 0x7d1   :  { %v897_v4 = vpop.f32.mrb[30].mxu0 }
 0x7d2   :  { %v901_v5 = vpack.c.bf16 %v897_v4, %v894_v44  ;;  %v1938_v41 = vpop.f32.mrb[31].mxu0 }
 0x7d4   :  { %1940 = vmatpush3.bf16.msra.mxu1 %v901_v5 }
 0x7d5   :  { %1955 = vmatprep.subr.bf16.mxu1 %v2093_v3 }
 0x7d7   :  { %1942 = vmatmul.mubr.msk.bf16.vlgmr.msra.gmra.mrb[28].mxu1 %vm116_vm3, %v2364_v17  ;;  %v2423_v6 = vpop.f32.mrb[32].mxu0 }
 0x7d8   :  { %v1022_v7 = vpop.f32.mrb[33].mxu0  ;;  %1956 = vmatpush3.bf16.msra.mxu1 %v2417_v1  ;;  %1957 = vmatprep.mubr.msk.bf16.mxu1 %vm2094_vm1, %v2093_v3  ;;  %v1031_v5 = vadd.f32 %v2423_v6, %v2451_v22 }
 0x7d9   :  { %v2428_v8 = vpop.f32.mrb[34].mxu0  ;;  %1961 = vmatprep.subr.bf16.mxu1 %v2093_v3  ;;  %v1023_v23 = vadd.f32 %v2451_v22, %v1022_v7 }
 0x7da   :  { %v1025_v9 = vpop.f32.mrb[35].mxu0 }
 0x7db   :  { %v1026_v25 = vadd.f32 %v2451_v22, %v1025_v9 }
 0x7df   :  { %1958 = vmatmul.mubr.bf16.vlgmr.msra.gmra.mrb[32].mxu1 %v2095_v10 }
 0x7e0   :  { %1962 = vmatpush3.bf16.msra.mxu1 %v2417_v1  ;;  %1963 = vmatprep.mubr.msk.bf16.mxu1 %vm2094_vm1, %v2093_v3 }
 0x7e1   :  { %1973 = vmatprep.subr.bf16.mxu1 %v2093_v3 }
 0x8aa   :  { %v2435_v11 = vpop.f32.mrb[28].mxu1 }
 0x8ab   :  { %v1943_v12 = vpop.f32.mrb[29].mxu1 }
 0x8ac   :  { %v2437_v13 = vpop.f32.mrb[30].mxu1 }
 0x8ad   :  { %v1944_v14 = vpop.f32.mrb[31].mxu1 }
 0x8b2   :  { %v1097_v16 = vpop.f32.mrb[32].mxu1 }
 0x8b3   :  { %v1098_v17 = vadd.f32 %v2442_v15, %v1097_v16  ;;  %v1959_v18 = vpop.f32.mrb[33].mxu1 }
 0x8b4   :  { %v1100_v19 = vpop.f32.mrb[34].mxu1 }
 0x8b5   :  { %v1101_v20 = vadd.f32 %v2442_v15, %v1100_v19  ;;  %1120 = vrot.lane.b32.xlu0 %v1098_v17, %s2096_s18  ;;  %v1960_v21 = vpop.f32.mrb[35].mxu1  ;;  %v1104_v24 = vadd.f32 %v1098_v17, %v1023_v23 }
 0x8b7   :  { %1122 = vrot.lane.b32.xlu1 %v1101_v20, %s2096_s18  ;;  %v1779_v26 = vmul.f32 -1.442695, %v1104_v24  ;;  %v1105_v27 = vadd.f32 %v1101_v20, %v1026_v25 }
 0x8b9   :  { %1997 = vpow2.f32 %v1779_v26  ;;  %v1780_v28 = vmul.f32 -1.442695, %v1105_v27 }
 0x8bb   :  { %1999 = vpow2.f32 %v1780_v28 }
 0x8c3   :  { %v1998_v29 = vpop.eup %1997 }
 0x8c4   :  { %v1112_v30 = vadd.f32 1.0, %v1998_v29 }
 0x8c5   :  { %v2000_v31 = vpop.eup %1999 }
 0x8c6   :  { %2001 = vrcp.f32 %v1112_v30  ;;  %v1113_v33 = vadd.f32 1.0, %v2000_v31 }
 0x8c8   :  { %2003 = vrcp.f32 %v1113_v33 }
 0x8d0   :  { %v2002_v34 = vpop.eup %2001 }
 0x8d1   :  { %v1140_v51 = vsub.f32 1.0, %v2002_v34  ;;  %v1152_v55 = vmul.f32 0.0, %v2002_v34 }
 0x8d2   :  { %v2004_v40 = vpop.eup %2003 }
 0x8d3   :  { %v1141_v53 = vsub.f32 1.0, %v2004_v40  ;;  %v1153_v56 = vmul.f32 0.0, %v2004_v40 }
 0x927   :  { %v1121_v36 = vpop.permute.xlu0 %1120 }
 0x928   :  { %v1126_v37 = vmul.f32 %v2002_v34, %v1121_v36  ;;  %v722_v36 = vmul.f32 %v2396_v35, %v2396_v35 }
 0x929   :  { %v1123_v39 = vpop.permute.xlu1 %1122 }
 0x92a   :  { %1130 = vrot.lane.b32.xlu1 %v1126_v37, %s2097_s8  ;;  %v1127_v42 = vmul.f32 %v2004_v40, %v1123_v39  ;;  %v724_v40 = vsel %vm116_vm3, %v722_v36, 0.0 }
 0x92e   :  { %1132 = vrot.lane.b32.xlu1 %v1127_v42, %s2097_s8 }
 0x99c   :  { %v1131_v43 = vpop.permute.xlu1 %1130 }
 0x99d   :  { %v1136_v45 = vadd.f32 %v1131_v43, %v1023_v23 }
 0x99f   :  { %2005 = vtanh.f32 %v1136_v45 }
 0x9a0   :  { %v1133_v46 = vpop.permute.xlu1 %1132 }
 0x9a1   :  { %v1137_v47 = vadd.f32 %v1133_v46, %v1026_v25 }
 0x9a3   :  { %2007 = vtanh.f32 %v1137_v47 }
 0x9a9   :  { %v2006_v48 = vpop.eup %2005 }
 0x9aa   :  { %1144 = vrot.lane.b32.xlu0 %v2006_v48, %s2098_s9 }
 0x9ad   :  { %v2008_v49 = vpop.eup %2007 }
 0x9ae   :  { %1146 = vrot.lane.b32.xlu1 %v2008_v49, %s2098_s9 }
 0xa1c   :  { %v1145_v50 = vpop.permute.xlu0 %1144 }
 0xa1d   :  { %v1150_v52 = vmul.f32 %v1145_v50, %v1140_v51 }
 0xa1f   :  { %v2459_v59 = vadd.f32 %v1152_v55, %v1150_v52 }
 0xa20   :  { %v1147_v54 = vpop.permute.xlu1 %1146 }
 0xa21   :  { %v1151_v57 = vmul.f32 %v1147_v54, %v1141_v53 }
 0xa23   :  { %v2461_v60 = vadd.f32 %v1153_v56, %v1151_v57 }
 0xa25   :  { %v1229_v62 = vpack.c.bf16 %v2461_v60, %v2459_v59 }
 0xa27   :  { %1231 = vrot.lane.b32.xlu0 %v1229_v62, %s2098_s9 }
 0xa99   :  { %v1232_v63 = vpop.permute.xlu0 %1231 }
 0xa9a   :  { %1964 = vmatmul.mubr.msk.bf16.vlgmr.msra.gmra.mrb[36].mxu1 %vm116_vm3, %v1232_v63 }
 0xa9b   :  { %1974 = vmatpush3.bf16.msra.mxu1 %v2417_v1  ;;  %1975 = vmatprep.mubr.msk.bf16.mxu1 %vm2094_vm1, %v2093_v3  ;;  %v1034_v1 = vadd.f32 %v2428_v8, %v2451_v22  ;;  %v719_v8 = vadd.f32 %v2393_v32, %v2398_v38  ;;  %v1771_v32 = vld [vmem:[%s2675_s5 + $0x3] ss:$0 sm:$0xff] }
 0xa9c   :  { %v945_v38 = vadd.f32 %v1771_v32, %v2435_v11  ;;  %v948_v33 = vadd.f32 %v1771_v32, %v2437_v13 }
 0xa9d   :  { %v723_v24 = vmul.f32 %v719_v8, %v719_v8 }
 0xa9e   :  { %v951_v34 = vmul.f32 %v945_v38, %v945_v38  ;;  %v952_v39 = vmul.f32 %v948_v33, %v948_v33 }
 0xa9f   :  { %v727_v25 = vsel %vm116_vm3, %v723_v24, 0.0 }
 0xaa0   :  { %v953_v37 = vsel %vm116_vm3, %v951_v34, 0.0  ;;  %v956_v42 = vsel %vm116_vm3, %v952_v39, 0.0 }
 0xb6d   :  { %v1270_v61 = vpop.f32.mrb[36].mxu1 }
 0xb6e   :  { %v1271_v58 = vadd.f32 %v2442_v15, %v1270_v61  ;;  %v1965_v0 = vpop.f32.mrb[37].mxu1 }
 0xb6f   :  { %v1273_v44 = vpop.f32.mrb[38].mxu1 }
 0xb70   :  { %v1274_v2 = vadd.f32 %v2442_v15, %v1273_v44  ;;  %1293 = vrot.lane.b32.xlu1 %v1271_v58, %s2096_s18  ;;  %v1966_v4 = vpop.f32.mrb[39].mxu1  ;;  %v1277_v41 = vadd.f32 %v1271_v58, %v1031_v5 }
 0xb72   :  { %1295 = vrot.lane.b32.xlu0 %v1274_v2, %s2096_s18  ;;  %v1278_v7 = vadd.f32 %v1274_v2, %v1034_v1  ;;  %v1784_v9 = vmul.f32 -1.442695, %v1277_v41 }
 0xb74   :  { %v1785_v10 = vmul.f32 -1.442695, %v1278_v7  ;;  %2009 = vpow2.f32 %v1784_v9 }
 0xb76   :  { %2011 = vpow2.f32 %v1785_v10 }
 0xb7e   :  { %v2010_v12 = vpop.eup %2009 }
 0xb7f   :  { %v1285_v16 = vadd.f32 1.0, %v2010_v12 }
 0xb80   :  { %v2012_v14 = vpop.eup %2011 }
 0xb81   :  { %v1286_v17 = vadd.f32 1.0, %v2012_v14  ;;  %2013 = vrcp.f32 %v1285_v16 }
 0xb83   :  { %2015 = vrcp.f32 %v1286_v17 }
 0xb8b   :  { %v2014_v18 = vpop.eup %2013 }
 0xb8c   :  { %v1313_v45 = vsub.f32 1.0, %v2014_v18  ;;  %v1325_v48 = vmul.f32 %v2014_v18, %v2459_v59 }
 0xb8d   :  { %v2016_v21 = vpop.eup %2015 }
 0xb8e   :  { %v1314_v47 = vsub.f32 1.0, %v2016_v21  ;;  %v1326_v49 = vmul.f32 %v2016_v21, %v2461_v60 }
 0xbe2   :  { %v1294_v19 = vpop.permute.xlu1 %1293 }
 0xbe3   :  { %v1299_v20 = vmul.f32 %v2014_v18, %v1294_v19 }
 0xbe4   :  { %v1296_v6 = vpop.permute.xlu0 %1295 }
 0xbe5   :  { %v1300_v23 = vmul.f32 %v2016_v21, %v1296_v6  ;;  %1303 = vrot.lane.b32.xlu1 %v1299_v20, %s2097_s8 }
 0xbe7   :  { %1305 = vrot.lane.b32.xlu0 %v1300_v23, %s2097_s8 }
 0xc06   :  { %728 = vadd.xlane.f32.xlu0 %v727_v25 }
 0xc57   :  { %v1304_v26 = vpop.permute.xlu1 %1303 }
 0xc58   :  { %v1309_v27 = vadd.f32 %v1304_v26, %v1031_v5 }
 0xc59   :  { %v1306_v28 = vpop.permute.xlu0 %1305 }
 0xc5a   :  { %2017 = vtanh.f32 %v1309_v27  ;;  %v1310_v29 = vadd.f32 %v1306_v28, %v1034_v1 }
 0xc5c   :  { %2019 = vtanh.f32 %v1310_v29 }
 0xc64   :  { %v2018_v30 = vpop.eup %2017 }
 0xc65   :  { %1317 = vrot.lane.b32.xlu1 %v2018_v30, %s2098_s9 }
 0xc66   :  { %v2020_v31 = vpop.eup %2019 }
 0xc67   :  { %1319 = vrot.lane.b32.xlu0 %v2020_v31, %s2098_s9 }
 0xc86   :  { %954 = vadd.xlane.f32.xlu0 %v953_v37 }
 0xc89   :  { %725 = vadd.xlane.f32.xlu1 %v724_v40 }
 0xc8a   :  { %957 = vadd.xlane.f32.xlu0 %v956_v42 }
 0xc93   :  { %v729_v43 = vpop.xlane.xlu0 %728 }
 0xc94   :  { %v731_v54 = vmax.f32 %v729_v43, 1e-24 }
 0xc96   :  { %2021 = vrsqrt.f32 %v731_v54 }
 0xca0   :  { %v2022_v58 = vpop.eup %2021 }
 0xca1   :  { %v735_v5 = vmul.f32 %v2022_v58, %v719_v8 }
 0xcd7   :  { %v1318_v46 = vpop.permute.xlu1 %1317 }
 0xcd8   :  { %v1323_v11 = vmul.f32 %v1318_v46, %v1313_v45 }
 0xcd9   :  { %v1320_v13 = vpop.permute.xlu0 %1319 }
 0xcda   :  { %v1324_v50 = vmul.f32 %v1320_v13, %v1314_v47  ;;  %v2497_v51 = vadd.f32 %v1325_v48, %v1323_v11 }
 0xcdc   :  { %v2499_v52 = vadd.f32 %v1326_v49, %v1324_v50 }
 0xcde   :  { %v1386_v53 = vpack.c.bf16 %v2499_v52, %v2497_v51 }
 0xce0   :  { %1388 = vrot.lane.b32.xlu1 %v1386_v53, %s2098_s9 }
 0xd13   :  { %v955_v55 = vpop.xlane.xlu0 %954 }
 0xd14   :  { %v959_v56 = vmax.f32 %v955_v55, 1e-24 }
 0xd16   :  { %v726_v57 = vpop.xlane.xlu1 %725  ;;  %2023 = vrsqrt.f32 %v959_v56 }
 0xd17   :  { %v730_v62 = vmax.f32 %v726_v57, 1e-24  ;;  %v958_v63 = vpop.xlane.xlu0 %957 }
 0xd18   :  { %v960_v61 = vmax.f32 %v958_v63, 1e-24 }
 0xd19   :  { %2025 = vrsqrt.f32 %v730_v62 }
 0xd1a   :  { %2027 = vrsqrt.f32 %v960_v61 }
 0xd20   :  { %v2024_v0 = vpop.eup %2023 }
 0xd21   :  { %v963_v1 = vmul.f32 %v2024_v0, %v945_v38 }
 0xd23   :  { %v2026_v44 = vpop.eup %2025 }
 0xd24   :  { %v2028_v2 = vpop.eup %2027  ;;  %v734_v4 = vmul.f32 %v2026_v44, %v2396_v35 }
 0xd25   :  { %v964_v41 = vmul.f32 %v2028_v2, %v948_v33 }
 0xd26   :  { %v967_v7 = vpack.c.bf16 %v735_v5, %v734_v4 }
 0xd27   :  { %v968_v9 = vpack.c.bf16 %v964_v41, %v963_v1 }
 0xd28   :  { %1951 = vmatprep.mubr.msk.bf16.mxu0 %vm116_vm3, %v967_v7 }
 0xd29   :  { %1952 = vmatmul.mubr.msk.bf16.gmra.mrb[36].mxu0 %vm116_vm3, %v968_v9 }
 0xd2a   :  { %1969 = vmatprep.mubr.msk.bf16.mxu0 %vm2094_vm1, %v2093_v3 }
 0xd52   :  { %v1389_v10 = vpop.permute.xlu1 %1388 }
 0xd53   :  { %1970 = vmatmul.mubr.msk.bf16.vlgmr.msra.gmra.mrb[40].mxu0 %vm116_vm3, %v1389_v10 }
 0xdfc   :  { %v2510_v12 = vpop.f32.mrb[36].mxu0 }
 0xdfd   :  { %v1038_v14 = vpop.f32.mrb[37].mxu0  ;;  %v1047_v2 = vadd.f32 %v2510_v12, %v2451_v22 }
 0xdfe   :  { %v2512_v16 = vpop.f32.mrb[38].mxu0  ;;  %v1039_v3 = vadd.f32 %v2451_v22, %v1038_v14 }
 0xdff   :  { %v1041_v35 = vpop.f32.mrb[39].mxu0  ;;  %v1050_v4 = vadd.f32 %v2512_v16, %v2451_v22 }
 0xe00   :  { %v1042_v8 = vadd.f32 %v2451_v22, %v1041_v35 }
 0xe26   :  { %v1427_v17 = vpop.f32.mrb[40].mxu0 }
 0xe27   :  { %v1428_v18 = vadd.f32 %v2442_v15, %v1427_v17  ;;  %v1971_v19 = vpop.f32.mrb[41].mxu0 }
 0xe28   :  { %v1430_v20 = vpop.f32.mrb[42].mxu0 }
 0xe29   :  { %v1431_v21 = vadd.f32 %v2442_v15, %v1430_v20  ;;  %1450 = vrot.lane.b32.xlu0 %v1428_v18, %s2096_s18  ;;  %v1972_v6 = vpop.f32.mrb[43].mxu0  ;;  %v1434_v23 = vadd.f32 %v1428_v18, %v1039_v3 }
 0xe2b   :  { %1452 = vrot.lane.b32.xlu1 %v1431_v21, %s2096_s18  ;;  %v1787_v24 = vmul.f32 -1.442695, %v1434_v23  ;;  %v1435_v25 = vadd.f32 %v1431_v21, %v1042_v8 }
 0xe2d   :  { %2029 = vpow2.f32 %v1787_v24  ;;  %v1788_v26 = vmul.f32 -1.442695, %v1435_v25 }
 0xe2f   :  { %2031 = vpow2.f32 %v1788_v26 }
 0xe37   :  { %v2030_v27 = vpop.eup %2029 }
 0xe38   :  { %v1442_v28 = vadd.f32 1.0, %v2030_v27 }
 0xe39   :  { %v2032_v29 = vpop.eup %2031 }
 0xe3a   :  { %2033 = vrcp.f32 %v1442_v28  ;;  %v1443_v30 = vadd.f32 1.0, %v2032_v29 }
 0xe3c   :  { %2035 = vrcp.f32 %v1443_v30 }
 0xe44   :  { %v2034_v31 = vpop.eup %2033 }
 0xe45   :  { %v1470_v11 = vsub.f32 1.0, %v2034_v31  ;;  %v1482_v49 = vmul.f32 %v2034_v31, %v2497_v51 }
 0xe46   :  { %v2036_v34 = vpop.eup %2035 }
 0xe47   :  { %v1471_v13 = vsub.f32 1.0, %v2036_v34  ;;  %v1483_v50 = vmul.f32 %v2036_v34, %v2499_v52 }
 0xe9b   :  { %v1451_v32 = vpop.permute.xlu0 %1450 }
 0xe9c   :  { %v1456_v38 = vmul.f32 %v2034_v31, %v1451_v32 }
 0xe9d   :  { %v1453_v33 = vpop.permute.xlu1 %1452 }
 0xe9e   :  { %1460 = vrot.lane.b32.xlu1 %v1456_v38, %s2097_s8  ;;  %v1457_v36 = vmul.f32 %v2036_v34, %v1453_v33 }
 0xea2   :  { %1462 = vrot.lane.b32.xlu1 %v1457_v36, %s2097_s8 }
 0xf10   :  { %v1461_v37 = vpop.permute.xlu1 %1460 }
 0xf11   :  { %v1466_v39 = vadd.f32 %v1461_v37, %v1039_v3 }
 0xf13   :  { %2037 = vtanh.f32 %v1466_v39 }
 0xf14   :  { %v1463_v40 = vpop.permute.xlu1 %1462 }
 0xf15   :  { %v1467_v42 = vadd.f32 %v1463_v40, %v1042_v8 }
 0xf17   :  { %2039 = vtanh.f32 %v1467_v42 }
 0xf1d   :  { %v2038_v43 = vpop.eup %2037 }
 0xf1e   :  { %1474 = vrot.lane.b32.xlu0 %v2038_v43, %s2098_s9 }
 0xf21   :  { %v2040_v45 = vpop.eup %2039 }
 0xf22   :  { %1476 = vrot.lane.b32.xlu1 %v2040_v45, %s2098_s9 }
 0xf90   :  { %v1475_v46 = vpop.permute.xlu0 %1474 }
 0xf91   :  { %v1480_v47 = vmul.f32 %v1475_v46, %v1470_v11 }
 0xf93   :  { %v2526_v54 = vadd.f32 %v1482_v49, %v1480_v47 }
 0xf94   :  { %v1477_v48 = vpop.permute.xlu1 %1476 }
 0xf95   :  { %v1481_v53 = vmul.f32 %v1477_v48, %v1471_v13 }
 0xf97   :  { %v2528_v55 = vadd.f32 %v1483_v50, %v1481_v53 }
 0xf99   :  { %v1543_v56 = vpack.c.bf16 %v2528_v55, %v2526_v54 }
 0xf9b   :  { %1545 = vrot.lane.b32.xlu0 %v1543_v56, %s2098_s9 }
0x100d   :  { %v1546_v57 = vpop.permute.xlu0 %1545 }
0x100e   :  { %1976 = vmatmul.mubr.msk.bf16.vlgmr.msra.gmra.mrb[40].mxu1 %vm116_vm3, %v1546_v57 }
0x10e1   :  { %v1584_v62 = vpop.f32.mrb[40].mxu1 }
0x10e2   :  { %v1585_v63 = vadd.f32 %v2442_v15, %v1584_v62  ;;  %v1977_v61 = vpop.f32.mrb[41].mxu1 }
0x10e3   :  { %v1587_v58 = vpop.f32.mrb[42].mxu1 }
0x10e4   :  { %v1588_v0 = vadd.f32 %v2442_v15, %v1587_v58  ;;  %1607 = vrot.lane.b32.xlu1 %v1585_v63, %s2096_s18  ;;  %v1978_v44 = vpop.f32.mrb[43].mxu1  ;;  %v1591_v5 = vadd.f32 %v1585_v63, %v1047_v2 }
0x10e6   :  { %1609 = vrot.lane.b32.xlu0 %v1588_v0, %s2096_s18  ;;  %v1592_v1 = vadd.f32 %v1588_v0, %v1050_v4  ;;  %v1790_v41 = vmul.f32 -1.442695, %v1591_v5 }
0x10e8   :  { %v1791_v7 = vmul.f32 -1.442695, %v1592_v1  ;;  %2041 = vpow2.f32 %v1790_v41 }
0x10ea   :  { %2043 = vpow2.f32 %v1791_v7 }
0x10f2   :  { %v2042_v9 = vpop.eup %2041 }
0x10f3   :  { %v1599_v15 = vadd.f32 1.0, %v2042_v9 }
0x10f4   :  { %v2044_v10 = vpop.eup %2043 }
0x10f5   :  { %v1600_v14 = vadd.f32 1.0, %v2044_v10  ;;  %2045 = vrcp.f32 %v1599_v15 }
0x10f7   :  { %2047 = vrcp.f32 %v1600_v14 }
0x10ff   :  { %v2046_v35 = vpop.eup %2045 }
0x1100   :  { %v1627_v8 = vsub.f32 1.0, %v2046_v35  ;;  %v1639_v25 = vmul.f32 %v2046_v35, %v2526_v54 }
0x1101   :  { %v2048_v19 = vpop.eup %2047 }
0x1102   :  { %v1628_v27 = vsub.f32 1.0, %v2048_v19  ;;  %v1640_v30 = vmul.f32 %v2048_v19, %v2528_v55 }
0x1156   :  { %v1608_v17 = vpop.permute.xlu1 %1607 }
0x1157   :  { %v1613_v18 = vmul.f32 %v2046_v35, %v1608_v17 }
0x1158   :  { %v1610_v12 = vpop.permute.xlu0 %1609 }
0x1159   :  { %v1614_v20 = vmul.f32 %v2048_v19, %v1610_v12  ;;  %1617 = vrot.lane.b32.xlu1 %v1613_v18, %s2097_s8 }
0x115b   :  { %1619 = vrot.lane.b32.xlu0 %v1614_v20, %s2097_s8 }
0x11cb   :  { %v1618_v22 = vpop.permute.xlu1 %1617 }
0x11cc   :  { %v1623_v16 = vadd.f32 %v1618_v22, %v1047_v2 }
0x11cd   :  { %v1620_v21 = vpop.permute.xlu0 %1619 }
0x11ce   :  { %2049 = vtanh.f32 %v1623_v16  ;;  %v1624_v6 = vadd.f32 %v1620_v21, %v1050_v4 }
0x11d0   :  { %2051 = vtanh.f32 %v1624_v6 }
0x11d8   :  { %v2050_v3 = vpop.eup %2049 }
0x11d9   :  { %1631 = vrot.lane.b32.xlu1 %v2050_v3, %s2098_s9 }
0x11da   :  { %v2052_v23 = vpop.eup %2051 }
0x11db   :  { %1633 = vrot.lane.b32.xlu0 %v2052_v23, %s2098_s9 }
0x11dd   :  { %1158 = vrot.lane.b32.xlu1 %v2459_v59, %s2098_s9 }
0x11df   :  { %1160 = vrot.lane.b32.xlu0 %v2461_v60, %s2098_s9 }
0x11e1   :  { %1331 = vrot.lane.b32.xlu1 %v2497_v51, %s2098_s9 }
0x11e3   :  { %1333 = vrot.lane.b32.xlu0 %v2499_v52, %s2098_s9 }
0x11e5   :  { %1488 = vrot.lane.b32.xlu1 %v2526_v54, %s2098_s9 }
0x11e7   :  { %1490 = vrot.lane.b32.xlu0 %v2528_v55, %s2098_s9 }
0x124b   :  { %v1632_v24 = vpop.permute.xlu1 %1631 }
0x124c   :  { %v1637_v26 = vmul.f32 %v1632_v24, %v1627_v8 }
0x124d   :  { %v1634_v28 = vpop.permute.xlu0 %1633 }
0x124e   :  { %v2559_v29 = vadd.f32 %v1639_v25, %v1637_v26  ;;  %v1638_v31 = vmul.f32 %v1634_v28, %v1628_v27 }
0x124f   :  { %v1159_v38 = vpop.permute.xlu1 %1158 }
0x1250   :  { %v1642_v32 = vadd.f32 %v1640_v30, %v1638_v31  ;;  %1645 = vrot.lane.b32.xlu1 %v2559_v29, %s2098_s9  ;;  %v1164_v39 = vsel %vm116_vm3, %v1159_v38, 0.0 }
0x1251   :  { %v1161_v33 = vpop.permute.xlu0 %1160 }
0x1252   :  { %1647 = vrot.lane.b32.xlu0 %v1642_v32, %s2098_s9  ;;  %v1167_v36 = vsel %vm116_vm3, %v1161_v33, 0.0  ;;  %v1782_v33 = vld [vmem:[%s2681_s11] ss:$0 sm:$0xff] }
0x1253   :  { %v1332_v34 = vpop.permute.xlu1 %1331 }
0x1254   :  { %v1337_v42 = vsel %vm116_vm3, %v1332_v34, 0.0 }
0x1255   :  { %v1334_v37 = vpop.permute.xlu0 %1333 }
0x1256   :  { %v1340_v45 = vsel %vm116_vm3, %v1334_v37, 0.0 }
0x1257   :  { %v1489_v40 = vpop.permute.xlu1 %1488 }
0x1258   :  { %v1494_v43 = vsel %vm116_vm3, %v1489_v40, 0.0 }
0x1259   :  { %v1491_v46 = vpop.permute.xlu0 %1490 }
0x125a   :  { %v1497_v11 = vsel %vm116_vm3, %v1491_v46, 0.0 }
0x1271   :  { %1168 = vadd.xlane.f32.xlu0 %v1167_v36 }
0x1274   :  { %1165 = vadd.xlane.f32.xlu1 %v1164_v39 }
0x1275   :  { %1338 = vadd.xlane.f32.xlu0 %v1337_v42 }
0x1278   :  { %1495 = vadd.xlane.f32.xlu1 %v1494_v43 }
0x1279   :  { %1341 = vadd.xlane.f32.xlu0 %v1340_v45 }
0x127d   :  { %1498 = vadd.xlane.f32.xlu0 %v1497_v11 }
0x12c2   :  { %v1646_v47 = vpop.permute.xlu1 %1645 }
0x12c3   :  { %v1651_v13 = vsel %vm116_vm3, %v1646_v47, 0.0 }
0x12c4   :  { %1652 = vadd.xlane.f32.xlu1 %v1651_v13  ;;  %v1648_v48 = vpop.permute.xlu0 %1647 }
0x12c5   :  { %v1654_v49 = vsel %vm116_vm3, %v1648_v48, 0.0 }
0x12c6   :  { %1655 = vadd.xlane.f32.xlu0 %v1654_v49 }
0x12fe   :  { %v1169_v50 = vpop.xlane.xlu0 %1168 }
0x12ff   :  { %v1172_v53 = vmul.f32 0.0625, %v1169_v50 }
0x1301   :  { %v2574_v56 = vsub.f32 %v2461_v60, %v1172_v53  ;;  %v1166_v57 = vpop.xlane.xlu1 %1165 }
0x1302   :  { %v1171_v62 = vmul.f32 0.0625, %v1166_v57  ;;  %v1339_v63 = vpop.xlane.xlu0 %1338 }
0x1303   :  { %v1343_v61 = vmul.f32 0.0625, %v1339_v63  ;;  %v1176_v58 = vmul.f32 %v2574_v56, %v2574_v56 }
0x1304   :  { %v2579_v0 = vsub.f32 %v2459_v59, %v1171_v62 }
0x1305   :  { %1181 = vrot.lane.b32.xlu0 %v1176_v58, %s2098_s9  ;;  %v2583_v44 = vsub.f32 %v2497_v51, %v1343_v61  ;;  %v1496_v4 = vpop.xlane.xlu1 %1495 }
0x1306   :  { %v1342_v2 = vpop.xlane.xlu0 %1341  ;;  %v1175_v60 = vmul.f32 %v2579_v0, %v2579_v0  ;;  %v1500_v1 = vmul.f32 0.0625, %v1496_v4 }
0x1307   :  { %v1344_v5 = vmul.f32 0.0625, %v1342_v2  ;;  %v1347_v59 = vmul.f32 %v2583_v44, %v2583_v44 }
0x1308   :  { %1179 = vrot.lane.b32.xlu1 %v1175_v60, %s2098_s9  ;;  %v2598_v10 = vsub.f32 %v2526_v54, %v1500_v1 }
0x1309   :  { %v2589_v41 = vsub.f32 %v2499_v52, %v1344_v5 }
0x130a   :  { %v1499_v7 = vpop.xlane.xlu0 %1498  ;;  %v1504_v14 = vmul.f32 %v2598_v10, %v2598_v10 }
0x130b   :  { %v1501_v9 = vmul.f32 0.0625, %v1499_v7  ;;  %v1348_v15 = vmul.f32 %v2589_v41, %v2589_v41 }
0x130c   :  { %1351 = vrot.lane.b32.xlu1 %v1347_v59, %s2098_s9 }
0x130d   :  { %v2595_v51 = vsub.f32 %v2528_v55, %v1501_v9 }
0x130f   :  { %v1505_v52 = vmul.f32 %v2595_v51, %v2595_v51 }
0x1310   :  { %1353 = vrot.lane.b32.xlu1 %v1348_v15, %s2098_s9 }
0x1311   :  { %1510 = vrot.lane.b32.xlu0 %v1505_v52, %s2098_s9 }
0x1314   :  { %1508 = vrot.lane.b32.xlu1 %v1504_v14, %s2098_s9 }
0x1351   :  { %v1653_v55 = vpop.xlane.xlu1 %1652 }
0x1352   :  { %v1657_v35 = vmul.f32 0.0625, %v1653_v55 }
0x1353   :  { %v1656_v17 = vpop.xlane.xlu0 %1655 }
0x1354   :  { %v2610_v54 = vsub.f32 %v2559_v29, %v1657_v35  ;;  %v1658_v18 = vmul.f32 0.0625, %v1656_v17  ;;  %v1781_v29 = vld [vmem:[%s2680_s10] ss:$0 sm:$0xff]  ;;  %s2100_s10 = smov [#allocation2]  }
0x1355   :  { %s1705_s11 = sshll.u32 %s2100_s10, 4  ;;  %s1706_s11 = int_to_ptr.vmem [resolvable:$true] %s1705_s11 }
0x1356   :  { %v2612_v19 = vsub.f32 %v1642_v32, %v1658_v18  ;;  %v1661_v12 = vmul.f32 %v2610_v54, %v2610_v54  ;;  %s2069_s26 = scalar_lea.vmem %s1706_s11, 1024  ;;  %p2074_p1 = scmp.lt.s32.totalorder %s1706_s11, %s1706_s11 }
0x1357   :  { %p2070_p0 = scmp.ne.s32.totalorder %s1706_s11, %s2069_s26  ;;  %p2075_p2 = scmp.lt.s32.totalorder %s2069_s26, %s2069_s26 }
0x1358   :  { %1665 = vrot.lane.b32.xlu1 %v1661_v12, %s2098_s9  ;;  %v1662_v20 = vmul.f32 %v2612_v19, %v2612_v19 }
0x1359   :  { %p2076_p3 = por %p2075_p2, %p2074_p1 }
0x135a   :  { %1667 = vrot.lane.b32.xlu0 %v1662_v20, %s2098_s9 }
0x135b   :  { %p2077_p4 = pnand %p2076_p3, %p2070_p0 }
0x1377   :  { %v1182_v22 = vpop.permute.xlu0 %1181 }
0x1378   :  { %v1188_v16 = vsel %vm116_vm3, %v1182_v22, 0.0 }
0x1379   :  { %1189 = vadd.xlane.f32.xlu0 %v1188_v16 }
0x137a   :  { %v1180_v21 = vpop.permute.xlu1 %1179 }
0x137b   :  { %v1185_v6 = vsel %vm116_vm3, %v1180_v21, 0.0 }
0x137c   :  { %1186 = vadd.xlane.f32.xlu1 %v1185_v6 }
0x137e   :  { %v1352_v3 = vpop.permute.xlu1 %1351 }
0x137f   :  { %v1357_v23 = vsel %vm116_vm3, %v1352_v3, 0.0 }
0x1380   :  { %1358 = vadd.xlane.f32.xlu1 %v1357_v23 }
0x1382   :  { %v1354_v8 = vpop.permute.xlu1 %1353 }
0x1383   :  { %v1360_v24 = vsel %vm116_vm3, %v1354_v8, 0.0  ;;  %v1511_v27 = vpop.permute.xlu0 %1510 }
0x1384   :  { %1361 = vadd.xlane.f32.xlu1 %v1360_v24  ;;  %v1517_v28 = vsel %vm116_vm3, %v1511_v27, 0.0 }
0x1386   :  { %v1509_v25 = vpop.permute.xlu1 %1508 }
0x1387   :  { %v1514_v26 = vsel %vm116_vm3, %v1509_v25, 0.0 }
0x1388   :  { %1515 = vadd.xlane.f32.xlu1 %v1514_v26 }
0x138c   :  { %1518 = vadd.xlane.f32.xlu1 %v1517_v28 }
0x138f   :  { %1204 = vrot.lane.b32.xlu0 %v1781_v29, %s2099_s1 }
0x13ca   :  { %v1666_v30 = vpop.permute.xlu1 %1665 }
0x13cb   :  { %v1671_v31 = vsel %vm116_vm3, %v1666_v30, 0.0 }
0x13cc   :  { %1672 = vadd.xlane.f32.xlu1 %v1671_v31  ;;  %v1668_v32 = vpop.permute.xlu0 %1667 }
0x13cd   :  { %v1674_v38 = vsel %vm116_vm3, %v1668_v32, 0.0 }
0x13ce   :  { %1675 = vadd.xlane.f32.xlu0 %v1674_v38 }
0x13dd   :  { %1214 = vrot.lane.b32.xlu1 %v1782_v33, %s2099_s1 }
0x1406   :  { %v1190_v40 = vpop.xlane.xlu0 %1189 }
0x1407   :  { %v1192_v43 = vmul.f32 0.0625, %v1190_v40 }
0x1409   :  { %v1187_v34 = vpop.xlane.xlu1 %1186  ;;  %v1194_v11 = vadd.f32 1e-05, %v1192_v43 }
0x140a   :  { %v1191_v39 = vmul.f32 0.0625, %v1187_v34  ;;  %v1205_v61 = vpop.permute.xlu0 %1204 }
0x140c   :  { %v1193_v45 = vadd.f32 1e-05, %v1191_v39 }
0x140d   :  { %v1359_v36 = vpop.xlane.xlu1 %1358 }
0x140e   :  { %2053 = vrsqrt.f32 %v1193_v45  ;;  %v1363_v13 = vmul.f32 0.0625, %v1359_v36 }
0x1410   :  { %v1365_v48 = vadd.f32 1e-05, %v1363_v13 }
0x1411   :  { %v1362_v37 = vpop.xlane.xlu1 %1361 }
0x1412   :  { %v1364_v42 = vmul.f32 0.0625, %v1362_v37 }
0x1414   :  { %v1366_v46 = vadd.f32 1e-05, %v1364_v42 }
0x1415   :  { %v1516_v47 = vpop.xlane.xlu1 %1515 }
0x1416   :  { %2055 = vrsqrt.f32 %v1366_v46  ;;  %v1520_v49 = vmul.f32 0.0625, %v1516_v47 }
0x1417   :  { %2057 = vrsqrt.f32 %v1194_v11 }
0x1418   :  { %2059 = vrsqrt.f32 %v1365_v48  ;;  %v1522_v53 = vadd.f32 1e-05, %v1520_v49  ;;  %v2054_v62 = vpop.eup %2053 }
0x1419   :  { %v1519_v50 = vpop.xlane.xlu1 %1518  ;;  %v1197_v60 = vmul.f32 %v2054_v62, %v2579_v0 }
0x141a   :  { %v1521_v57 = vmul.f32 0.0625, %v1519_v50  ;;  %2061 = vrsqrt.f32 %v1522_v53 }
0x141b   :  { %v1207_v52 = vmul.f32 %v1205_v61, %v1197_v60 }
0x141c   :  { %v1523_v58 = vadd.f32 1e-05, %v1521_v57 }
0x141e   :  { %2063 = vrsqrt.f32 %v1523_v58 }
0x1420   :  { %v2056_v63 = vpop.eup %2055 }
0x1421   :  { %v2058_v2 = vpop.eup %2057  ;;  %v1370_v4 = vmul.f32 %v2056_v63, %v2589_v41 }
0x1422   :  { %v1198_v59 = vmul.f32 %v2058_v2, %v2574_v56  ;;  %v2060_v55 = vpop.eup %2059 }
0x1423   :  { %v1372_v14 = vmul.f32 %v1370_v4, %v1205_v61  ;;  %v1369_v41 = vmul.f32 %v2060_v55, %v2583_v44 }
0x1424   :  { %v1208_v0 = vmul.f32 %v1205_v61, %v1198_v59  ;;  %v2062_v20 = vpop.eup %2061 }
0x1425   :  { %v1371_v22 = vmul.f32 %v1369_v41, %v1205_v61  ;;  %v1526_v16 = vmul.f32 %v2062_v20, %v2598_v10 }
0x1427   :  { %v1528_v23 = vmul.f32 %v1526_v16, %v1205_v61 }
0x1428   :  { %v2064_v21 = vpop.eup %2063 }
0x1429   :  { %v1527_v8 = vmul.f32 %v2064_v21, %v2595_v51 }
0x142b   :  { %v1529_v26 = vmul.f32 %v1527_v8, %v1205_v61 }
0x1459   :  { %v1673_v5 = vpop.xlane.xlu1 %1672 }
0x145a   :  { %v1677_v1 = vmul.f32 0.0625, %v1673_v5 }
0x145b   :  { %v1676_v7 = vpop.xlane.xlu0 %1675 }
0x145c   :  { %v1679_v9 = vadd.f32 1e-05, %v1677_v1  ;;  %v1678_v15 = vmul.f32 0.0625, %v1676_v7 }
0x145d   :  { %v1215_v35 = vpop.permute.xlu1 %1214 }
0x145e   :  { %2065 = vrsqrt.f32 %v1679_v9  ;;  %v1680_v17 = vadd.f32 1e-05, %v1678_v15  ;;  %v1217_v18 = vadd.f32 %v1215_v35, %v1207_v52  ;;  %v1374_v12 = vadd.f32 %v1372_v14, %v1215_v35 }
0x145f   :  { %v1218_v56 = vadd.f32 %v1215_v35, %v1208_v0  ;;  %v1373_v6 = vadd.f32 %v1371_v22, %v1215_v35  ;;  %v1530_v24 = vadd.f32 %v1528_v23, %v1215_v35  ;;  %v1531_v27 = vadd.f32 %v1529_v26, %v1215_v35 }
0x1460   :  { %1221 = vrot.lane.b32.xlu1 %v1217_v18, %s2098_s9  ;;  %1379 = vrot.lane.b32.xlu0 %v1374_v12, %s2098_s9  ;;  %2067 = vrsqrt.f32 %v1680_v17 }
0x1464   :  { %1223 = vrot.lane.b32.xlu1 %v1218_v56, %s2098_s9 }
0x1468   :  { %v2066_v3 = vpop.eup %2065  ;;  %1377 = vrot.lane.b32.xlu1 %v1373_v6, %s2098_s9 }
0x1469   :  { %v1683_v25 = vmul.f32 %v2066_v3, %v2610_v54 }
0x146a   :  { %v2068_v44 = vpop.eup %2067 }
0x146b   :  { %v1685_v28 = vmul.f32 %v1683_v25, %v1205_v61  ;;  %v1684_v29 = vmul.f32 %v2068_v44, %v2612_v19 }
0x146c   :  { %1534 = vrot.lane.b32.xlu1 %v1530_v24, %s2098_s9 }
0x146d   :  { %v1687_v10 = vadd.f32 %v1685_v28, %v1215_v35  ;;  %v1686_v30 = vmul.f32 %v1684_v29, %v1205_v61 }
0x146f   :  { %v1688_v31 = vadd.f32 %v1686_v30, %v1215_v35 }
0x1470   :  { %1536 = vrot.lane.b32.xlu1 %v1531_v27, %s2098_s9 }
0x1474   :  { %1691 = vrot.lane.b32.xlu1 %v1687_v10, %s2098_s9 }
0x1478   :  { %1693 = vrot.lane.b32.xlu1 %v1688_v31, %s2098_s9 }
0x14d2   :  { %v1222_v51 = vpop.permute.xlu1 %1221  ;;  %v1380_v32 = vpop.permute.xlu0 %1379 }
0x14d3   :  { %1227 = vst.msk [vmem:[#allocation2] sm:$0xff] %vm116_vm3, %v1222_v51  ;;  %1385 = vst.msk [vmem:[#allocation2 + $0x18] sm:$0xff] %vm116_vm3, %v1380_v32 }
0x14d6   :  { %v1224_v54 = vpop.permute.xlu1 %1223 }
0x14d7   :  { %1228 = vst.msk [vmem:[#allocation2 + $0x8] sm:$0xff] %vm116_vm3, %v1224_v54 }
0x14da   :  { %v1378_v38 = vpop.permute.xlu1 %1377 }
0x14db   :  { %1384 = vst.msk [vmem:[#allocation2 + $0x10] sm:$0xff] %vm116_vm3, %v1378_v38 }
0x14de   :  { %v1535_v19 = vpop.permute.xlu1 %1534 }
0x14df   :  { %1541 = vst.msk [vmem:[#allocation2 + $0x20] sm:$0xff] %vm116_vm3, %v1535_v19 }
0x14e2   :  { %v1537_v33 = vpop.permute.xlu1 %1536 }
0x14e3   :  { %1542 = vst.msk [vmem:[#allocation2 + $0x28] sm:$0xff] %vm116_vm3, %v1537_v33 }
0x14e6   :  { %v1692_v34 = vpop.permute.xlu1 %1691 }
0x14e7   :  { %1698 = vst.msk [vmem:[#allocation2 + $0x30] sm:$0xff] %vm116_vm3, %v1692_v34 }
0x14ea   :  { %v1694_v36 = vpop.permute.xlu1 %1693 }
0x14eb   :  { %1699 = vst.msk [vmem:[#allocation2 + $0x38] sm:$0xff] %vm116_vm3, %v1694_v36 }
0x14ec   :  { %2080 = shalt.err (!%p2077_p4)
}
0x14ed   :  { %s2081_s29 = scalar_lea.hbm %s2682_s12, 1024 }
0x14ee   :  { %p2082_p5 = scmp.ne.s32.totalorder %s2682_s12, %s2081_s29  ;;  %p2085_p6 = scmp.lt.u32.totalorder %s2081_s29, %s2682_s12 }
0x14f0   :  { %p2087_p7 = pnand %p2085_p6, %p2082_p5 }
0x14f2   :  { %2090 = shalt.err (!%p2087_p7)
}
0x14f3   :  { %s2101_s4 = smov 128   ;;  %s2102_s6 = smov 8  }
0x14f4   :  { %1711 = dma.vmem_to_hbm [thread:$0]  %s1706_s11, 1024, %s2682_s12, [#allocation3], %s2101_s4, %s2101_s4, %s2102_s6  }
0x14f5   :  { %2091 = dma.done.wait [#allocation3], 1024  }
0x14f6   :  { %2092 = vsyncadd [#allocation3], 4294966272 }
0x14f7   :  { %1715 = vsyncpa [#allocation3], 1 }

</bundles_post_ra>
